<compile_context>
chip_gen: v6e
topology: v6e:2x2x1
jax: 0.10.0
libtpu: 0.0.40
codegen_flags: <defaults>
</compile_context>

<pallas_src>
import jax
import jax.numpy as jnp
import numpy as np
from jax.experimental import pallas as pl
from jax.experimental.pallas import tpu as pltpu


MXU_DTYPE = jnp.float32   # knob: jnp.bfloat16 on v6e/v7x if accuracy budget allows
_UNROLL_T_MAX = 64        # fully unroll the time loop (static addressing) up to this length


# ---------------------------------------------------------------------------
# Pallas kernel: ONE invocation runs BOTH directions of one layer over the whole sequence.
# ---------------------------------------------------------------------------
def _bilstm_seq_kernel(xp_ref, whh_ref, out_ref):
    """
    xp_ref:  (D, T, B, 4H)  hoisted X @ W_ih^T + (b_ih + b_hh); gates (i,f,g,o) along the
                            last (lane) dim; direction 1 (if present) is already time-flipped.
    whh_ref: (D, H, 4H)     fused recurrent weights: h @ whh[d] -> all four gate pre-acts.
    out_ref: (T, B, D*H)    hidden states for every timestep, forward direction first
                            (PyTorch bidirectional output layout).
    """
    D, T, B, _ = xp_ref.shape
    H = whh_ref.shape[1]

    # Recurrent weights stay resident for the whole time loop.
    w = [whh_ref[d].astype(MXU_DTYPE) for d in range(D)]

    def cell(xp_t, h, c, w_d):
        # Single fused (B,H)@(H,4H) matmul for all four gates (f32 accumulation).
        gates = xp_t + jnp.dot(h.astype(MXU_DTYPE), w_d,
                               preferred_element_type=jnp.float32)        # (B, 4H)
        i_g = jax.nn.sigmoid(gates[:, 0 * H:1 * H])                        # static lane slices
        f_g = jax.nn.sigmoid(gates[:, 1 * H:2 * H])
        g_g = jnp.tanh(gates[:, 2 * H:3 * H])
        o_g = jax.nn.sigmoid(gates[:, 3 * H:4 * H])
        c_new = f_g * c + i_g * g_g
        h_new = o_g * jnp.tanh(c_new)
        return h_new, c_new

    if T <= _UNROLL_T_MAX:
        # Fully unrolled: all VMEM addresses are compile-time constants, h/c live in vregs,
        # and the T*D hidden states are written back with ONE lane-dense store at the end.
        h = [jnp.zeros((B, H), jnp.float32) for _ in range(D)]
        c = [jnp.zeros((B, H), jnp.float32) for _ in range(D)]
        outs = [[] for _ in range(D)]
        for s in range(T):
            for d in range(D):
                h[d], c[d] = cell(xp_ref[d, s], h[d], c[d], w[d])
                outs[d].append(h[d])
        # Dir 0 ran forward in time; dirs > 0 ran on time-flipped xp, so their output lists
        # are reversed here (free at trace time) to restore the original time order.
        per_dir = [jnp.stack(outs[0])] + [jnp.stack(outs[d][::-1]) for d in range(1, D)]
        out_ref[...] = jnp.concatenate(per_dir, axis=-1).astype(out_ref.dtype)
    else:
        # Large-T fallback: fixed partial unroll keeps MXU/EUP pipelining visible to the
        # scheduler without blowing the instruction footprint / vreg live ranges.
        def step(s, carry):
            hs, cs = carry
            new_hs, new_cs = [], []
            for d in range(D):
                h_new, c_new = cell(xp_ref[d, s], hs[d], cs[d], w[d])
                t_out = s if d == 0 else T - 1 - s
                out_ref[t_out, :, d * H:(d + 1) * H] = h_new.astype(out_ref.dtype)
                new_hs.append(h_new)
                new_cs.append(c_new)
            return tuple(new_hs), tuple(new_cs)

        zeros = tuple(jnp.zeros((B, H), jnp.float32) for _ in range(D))
        jax.lax.fori_loop(0, T, step, (zeros, zeros), unroll=8)


def _lstm_layer(x_tbe, layer_params):
    """Run one (possibly bidirectional) LSTM layer.

    x_tbe:        (T, B, E) float32, time-major
    layer_params: list over directions of dict(w_ih=(4H,E), w_hh=(4H,H), b_ih=(4H,), b_hh=(4H,))
                  (PyTorch layout, gate order i, f, g, o)
    returns:      (T, B, D*H) float32 — already the consumer layout (no post-call relayout)
    """
    T, B, E = x_tbe.shape
    D = len(layer_params)
    H = layer_params[0]["w_hh"].shape[1]

    w_ih = jnp.stack([p["w_ih"] for p in layer_params]).astype(jnp.float32)              # (D, 4H, E)
    bias = jnp.stack([p["b_ih"] + p["b_hh"] for p in layer_params]).astype(jnp.float32)  # (D, 4H)
    # Fused recurrent weights: h @ w_hh[d] -> (B, 4H) pre-activations for all four gates.
    w_hh = jnp.stack([p["w_hh"].T for p in layer_params]).astype(jnp.float32)            # (D, H, 4H)

    # Hoisted input projection over all timesteps & directions (one big XLA matmul);
    # the last dim stays 4H (lane dense), no reshape/transpose relayout afterwards.
    xp = jnp.einsum("tbe,dge->dtbg", x_tbe, w_ih) + bias[:, None, None, :]                # (D, T, B, 4H)
    # Direction 1 runs time-reversed: flip its xp slab ONCE here so the kernel uses static
    # forward time indices (no per-step select / dynamic addressing).
    if D == 2:
        xp = jnp.concatenate([xp[:1], xp[1:, ::-1]], axis=0)

    # Whole per-layer problem is VMEM-resident at these sizes: one kernel invocation,
    # full arrays in VMEM.  TODO(synk): time-chunk grid + vmem_limit_bytes for large T.
    return pl.pallas_call(
        _bilstm_seq_kernel,
        out_shape=jax.ShapeDtypeStruct((T, B, D * H), jnp.float32),
        in_specs=[pl.BlockSpec(memory_space=pltpu.MemorySpace.VMEM),
                  pl.BlockSpec(memory_space=pltpu.MemorySpace.VMEM)],
        out_specs=pl.BlockSpec(memory_space=pltpu.MemorySpace.VMEM),
    )(xp, w_hh)


@jax.jit
def _rnn_forward(embedding, params, batch):
    """batch: int32 token ids (B, T). Returns (B, T, num_directions*H)."""
    embeds = jnp.take(embedding, batch, axis=0)                # (B, T, E)
    x = jnp.transpose(embeds, (1, 0, 2)).astype(jnp.float32)   # (T, B, E) time-major
    for layer_params in params:
        x = _lstm_layer(x, layer_params)                       # (T, B, D*H)
    return jnp.transpose(x, (1, 0, 2))                         # (B, T, D*H) batch_first


class RnnPallas:
    """JAX/Pallas equivalent of the PyTorch `Rnn` module (LSTM path)."""

    def __init__(self, embedding_dim, hidden_dim, vocab_size, num_layers,
                 bidirectional, using_gru=False, seed=0):
        assert not using_gru, "GRU path not implemented"  # TODO(synk): GRU cell kernel
        self.embedding_dim = embedding_dim
        self.hidden_dim = hidden_dim
        self.num_layers = num_layers
        self.num_directions = 2 if bidirectional else 1

        key = jax.random.PRNGKey(seed)
        k_emb, key = jax.random.split(key)
        # nn.Embedding init ~ N(0, 1)
        self.embedding = jax.random.normal(
            k_emb, (vocab_size, embedding_dim), dtype=jnp.float32)

        # nn.LSTM init ~ U(-1/sqrt(H), 1/sqrt(H)) for all weights/biases
        bound = 1.0 / np.sqrt(hidden_dim)
        self.params = []  # list over layers; each layer: list over directions of dict
        for layer in range(num_layers):
            in_size = embedding_dim if layer == 0 else hidden_dim * self.num_directions
            layer_params = []
            for _ in range(self.num_directions):
                key, k1, k2, k3, k4 = jax.random.split(key, 5)
                layer_params.append(dict(
                    w_ih=jax.random.uniform(k1, (4 * hidden_dim, in_size),
                                            minval=-bound, maxval=bound, dtype=jnp.float32),
                    w_hh=jax.random.uniform(k2, (4 * hidden_dim, hidden_dim),
                                            minval=-bound, maxval=bound, dtype=jnp.float32),
                    b_ih=jax.random.uniform(k3, (4 * hidden_dim,),
                                            minval=-bound, maxval=bound, dtype=jnp.float32),
                    b_hh=jax.random.uniform(k4, (4 * hidden_dim,),
                                            minval=-bound, maxval=bound, dtype=jnp.float32),
                ))
            self.params.append(layer_params)

    def __call__(self, batch):
        return _rnn_forward(self.embedding, self.params, jnp.asarray(batch, jnp.int32))


# ---------------------------------------------------------------------------
# Pure-JAX reference (lax.scan) used to validate the Pallas kernel numerics.
# ---------------------------------------------------------------------------
def _lstm_layer_ref(x_tbe, w_ih, w_hh, b_ih, b_hh):
    H = w_hh.shape[1]
    B = x_tbe.shape[1]

    def step(carry, x_t):
        h, c = carry
        gates = x_t @ w_ih.T + h @ w_hh.T + b_ih + b_hh
        i = jax.nn.sigmoid(gates[:, 0 * H:1 * H])
        f = jax.nn.sigmoid(gates[:, 1 * H:2 * H])
        g = jnp.tanh(gates[:, 2 * H:3 * H])
        o = jax.nn.sigmoid(gates[:, 3 * H:4 * H])
        c = f * c + i * g
        h = o * jnp.tanh(c)
        return (h, c), h

    init = (jnp.zeros((B, H), jnp.float32), jnp.zeros((B, H), jnp.float32))
    _, ys = jax.lax.scan(step, init, x_tbe)
    return ys


def _forward_ref(model, batch):
    embeds = jnp.take(model.embedding, batch, axis=0)
    x = jnp.transpose(embeds, (1, 0, 2)).astype(jnp.float32)
    for layer in range(model.num_layers):
        outs = []
        p = model.params[layer][0]
        outs.append(_lstm_layer_ref(x, p["w_ih"], p["w_hh"], p["b_ih"], p["b_hh"]))
        if model.num_directions == 2:
            p = model.params[layer][1]
            outs.append(_lstm_layer_ref(x[::-1], p["w_ih"], p["w_hh"], p["b_ih"], p["b_hh"])[::-1])
        x = jnp.concatenate(outs, axis=-1)
    return jnp.transpose(x, (1, 0, 2))


if __name__ == "__main__":
    # Config consistent with the module's forward:
    #   vocab_size=50, embedding_dim=32, hidden_dim=32, num_layers=2, bidirectional=True
    #   batch of 2 sentences of length 8 (int token ids).
    B, T = 2, 8
    vocab_size, embedding_dim, hidden_dim = 50, 32, 32
    num_layers, bidirectional = 2, True

    model = RnnPallas(embedding_dim, hidden_dim, vocab_size,
                      num_layers, bidirectional, using_gru=False, seed=0)

    key = jax.random.PRNGKey(0)
    batch = jax.random.randint(key, (B, T), minval=0, maxval=vocab_size, dtype=jnp.int32)

    rnn_out = jax.block_until_ready(model(batch))
    assert rnn_out.shape == (B, T, hidden_dim * (2 if bidirectional else 1)), rnn_out.shape

    ref = jax.block_until_ready(_forward_ref(model, batch))
    np.testing.assert_allclose(np.asarray(rnn_out), np.asarray(ref), rtol=1e-4, atol=1e-4)

    print("KERNEL_OK")
</pallas_src>

<mosaic_0001>
module attributes {stable_mosaic.version = 11 : i64} {
  func.func @_bilstm_seq_kernel(%arg0: memref<2x8x2x128xf32, #tpu.memory_space<vmem>>, %arg1: memref<2x32x128xf32, #tpu.memory_space<vmem>>, %arg2: memref<8x2x64xf32, #tpu.memory_space<vmem>>) attributes {dimension_semantics = [], scalar_prefetch = 0 : i64, scratch_operands = 0 : i64, tpu.core_type = #tpu.core_type<tc>} {
    %c0 = arith.constant 0 : index
    %c0_0 = arith.constant 0 : index
    %c0_1 = arith.constant 0 : index
    %0 = vector.load %arg1[%c0, %c0_0, %c0_1] : memref<2x32x128xf32, #tpu.memory_space<vmem>>, vector<1x32x128xf32>
    %1 = vector.shape_cast %0 : vector<1x32x128xf32> to vector<32x128xf32>
    %c1 = arith.constant 1 : index
    %c0_2 = arith.constant 0 : index
    %c0_3 = arith.constant 0 : index
    %2 = vector.load %arg1[%c1, %c0_2, %c0_3] : memref<2x32x128xf32, #tpu.memory_space<vmem>>, vector<1x32x128xf32>
    %3 = vector.shape_cast %2 : vector<1x32x128xf32> to vector<32x128xf32>
    %cst = arith.constant 0.000000e+00 : f32
    %4 = vector.broadcast %cst : f32 to vector<2x32xf32>
    %cst_4 = arith.constant 0.000000e+00 : f32
    %5 = vector.broadcast %cst_4 : f32 to vector<2x32xf32>
    %cst_5 = arith.constant 0.000000e+00 : f32
    %6 = vector.broadcast %cst_5 : f32 to vector<2x32xf32>
    %cst_6 = arith.constant 0.000000e+00 : f32
    %7 = vector.broadcast %cst_6 : f32 to vector<2x32xf32>
    %c0_7 = arith.constant 0 : index
    %c0_8 = arith.constant 0 : index
    %c0_9 = arith.constant 0 : index
    %c0_10 = arith.constant 0 : index
    %8 = vector.load %arg0[%c0_7, %c0_8, %c0_9, %c0_10] : memref<2x8x2x128xf32, #tpu.memory_space<vmem>>, vector<1x1x2x128xf32>
    %9 = vector.shape_cast %8 : vector<1x1x2x128xf32> to vector<2x128xf32>
    %cst_11 = arith.constant dense<0.000000e+00> : vector<2x128xf32>
    %10 = tpu.matmul %4, %1, %cst_11 {dimension_numbers = #tpu.dot_dimension_numbers<[1], [0], [0], [1], [0, 0, 1, 1], [], []>} : vector<2x32xf32>, vector<32x128xf32>, vector<2x128xf32> -> vector<2x128xf32>
    %11 = arith.addf %9, %10 : vector<2x128xf32>
    %12 = vector.extract_strided_slice %11 {offsets = [0, 0], sizes = [2, 32], strides = [1, 1]} : vector<2x128xf32> to vector<2x32xf32>
    %13 = arith.negf %12 : vector<2x32xf32>
    %14 = math.exp %13 : vector<2x32xf32>
    %cst_12 = arith.constant 1.000000e+00 : f32
    %15 = vector.broadcast %cst_12 : f32 to vector<2x32xf32>
    %16 = arith.addf %15, %14 : vector<2x32xf32>
    %17 = arith.divf %15, %16 : vector<2x32xf32>
    %18 = vector.extract_strided_slice %11 {offsets = [0, 32], sizes = [2, 32], strides = [1, 1]} : vector<2x128xf32> to vector<2x32xf32>
    %19 = arith.negf %18 : vector<2x32xf32>
    %20 = math.exp %19 : vector<2x32xf32>
    %cst_13 = arith.constant 1.000000e+00 : f32
    %21 = vector.broadcast %cst_13 : f32 to vector<2x32xf32>
    %22 = arith.addf %21, %20 : vector<2x32xf32>
    %23 = arith.divf %21, %22 : vector<2x32xf32>
    %24 = vector.extract_strided_slice %11 {offsets = [0, 64], sizes = [2, 32], strides = [1, 1]} : vector<2x128xf32> to vector<2x32xf32>
    %25 = math.tanh %24 : vector<2x32xf32>
    %26 = vector.extract_strided_slice %11 {offsets = [0, 96], sizes = [2, 32], strides = [1, 1]} : vector<2x128xf32> to vector<2x32xf32>
    %27 = arith.negf %26 : vector<2x32xf32>
    %28 = math.exp %27 : vector<2x32xf32>
    %cst_14 = arith.constant 1.000000e+00 : f32
    %29 = vector.broadcast %cst_14 : f32 to vector<2x32xf32>
    %30 = arith.addf %29, %28 : vector<2x32xf32>
    %31 = arith.divf %29, %30 : vector<2x32xf32>
    %32 = arith.mulf %23, %6 : vector<2x32xf32>
    %33 = arith.mulf %17, %25 : vector<2x32xf32>
    %34 = arith.addf %32, %33 : vector<2x32xf32>
    %35 = math.tanh %34 : vector<2x32xf32>
    %36 = arith.mulf %31, %35 : vector<2x32xf32>
    %c1_15 = arith.constant 1 : index
    %c0_16 = arith.constant 0 : index
    %c0_17 = arith.constant 0 : index
    %c0_18 = arith.constant 0 : index
    %37 = vector.load %arg0[%c1_15, %c0_16, %c0_17, %c0_18] : memref<2x8x2x128xf32, #tpu.memory_space<vmem>>, vector<1x1x2x128xf32>
    %38 = vector.shape_cast %37 : vector<1x1x2x128xf32> to vector<2x128xf32>
    %cst_19 = arith.constant dense<0.000000e+00> : vector<2x128xf32>
    %39 = tpu.matmul %5, %3, %cst_19 {dimension_numbers = #tpu.dot_dimension_numbers<[1], [0], [0], [1], [0, 0, 1, 1], [], []>} : vector<2x32xf32>, vector<32x128xf32>, vector<2x128xf32> -> vector<2x128xf32>
    %40 = arith.addf %38, %39 : vector<2x128xf32>
    %41 = vector.extract_strided_slice %40 {offsets = [0, 0], sizes = [2, 32], strides = [1, 1]} : vector<2x128xf32> to vector<2x32xf32>
    %42 = arith.negf %41 : vector<2x32xf32>
    %43 = math.exp %42 : vector<2x32xf32>
    %cst_20 = arith.constant 1.000000e+00 : f32
    %44 = vector.broadcast %cst_20 : f32 to vector<2x32xf32>
    %45 = arith.addf %44, %43 : vector<2x32xf32>
    %46 = arith.divf %44, %45 : vector<2x32xf32>
    %47 = vector.extract_strided_slice %40 {offsets = [0, 32], sizes = [2, 32], strides = [1, 1]} : vector<2x128xf32> to vector<2x32xf32>
    %48 = arith.negf %47 : vector<2x32xf32>
    %49 = math.exp %48 : vector<2x32xf32>
    %cst_21 = arith.constant 1.000000e+00 : f32
    %50 = vector.broadcast %cst_21 : f32 to vector<2x32xf32>
    %51 = arith.addf %50, %49 : vector<2x32xf32>
    %52 = arith.divf %50, %51 : vector<2x32xf32>
    %53 = vector.extract_strided_slice %40 {offsets = [0, 64], sizes = [2, 32], strides = [1, 1]} : vector<2x128xf32> to vector<2x32xf32>
    %54 = math.tanh %53 : vector<2x32xf32>
    %55 = vector.extract_strided_slice %40 {offsets = [0, 96], sizes = [2, 32], strides = [1, 1]} : vector<2x128xf32> to vector<2x32xf32>
    %56 = arith.negf %55 : vector<2x32xf32>
    %57 = math.exp %56 : vector<2x32xf32>
    %cst_22 = arith.constant 1.000000e+00 : f32
    %58 = vector.broadcast %cst_22 : f32 to vector<2x32xf32>
    %59 = arith.addf %58, %57 : vector<2x32xf32>
    %60 = arith.divf %58, %59 : vector<2x32xf32>
    %61 = arith.mulf %52, %7 : vector<2x32xf32>
    %62 = arith.mulf %46, %54 : vector<2x32xf32>
    %63 = arith.addf %61, %62 : vector<2x32xf32>
    %64 = math.tanh %63 : vector<2x32xf32>
    %65 = arith.mulf %60, %64 : vector<2x32xf32>
    %c0_23 = arith.constant 0 : index
    %c1_24 = arith.constant 1 : index
    %c0_25 = arith.constant 0 : index
    %c0_26 = arith.constant 0 : index
    %66 = vector.load %arg0[%c0_23, %c1_24, %c0_25, %c0_26] : memref<2x8x2x128xf32, #tpu.memory_space<vmem>>, vector<1x1x2x128xf32>
    %67 = vector.shape_cast %66 : vector<1x1x2x128xf32> to vector<2x128xf32>
    %cst_27 = arith.constant dense<0.000000e+00> : vector<2x128xf32>
    %68 = tpu.matmul %36, %1, %cst_27 {dimension_numbers = #tpu.dot_dimension_numbers<[1], [0], [0], [1], [0, 0, 1, 1], [], []>} : vector<2x32xf32>, vector<32x128xf32>, vector<2x128xf32> -> vector<2x128xf32>
    %69 = arith.addf %67, %68 : vector<2x128xf32>
    %70 = vector.extract_strided_slice %69 {offsets = [0, 0], sizes = [2, 32], strides = [1, 1]} : vector<2x128xf32> to vector<2x32xf32>
    %71 = arith.negf %70 : vector<2x32xf32>
    %72 = math.exp %71 : vector<2x32xf32>
    %cst_28 = arith.constant 1.000000e+00 : f32
    %73 = vector.broadcast %cst_28 : f32 to vector<2x32xf32>
    %74 = arith.addf %73, %72 : vector<2x32xf32>
    %75 = arith.divf %73, %74 : vector<2x32xf32>
    %76 = vector.extract_strided_slice %69 {offsets = [0, 32], sizes = [2, 32], strides = [1, 1]} : vector<2x128xf32> to vector<2x32xf32>
    %77 = arith.negf %76 : vector<2x32xf32>
    %78 = math.exp %77 : vector<2x32xf32>
    %cst_29 = arith.constant 1.000000e+00 : f32
    %79 = vector.broadcast %cst_29 : f32 to vector<2x32xf32>
    %80 = arith.addf %79, %78 : vector<2x32xf32>
    %81 = arith.divf %79, %80 : vector<2x32xf32>
    %82 = vector.extract_strided_slice %69 {offsets = [0, 64], sizes = [2, 32], strides = [1, 1]} : vector<2x128xf32> to vector<2x32xf32>
    %83 = math.tanh %82 : vector<2x32xf32>
    %84 = vector.extract_strided_slice %69 {offsets = [0, 96], sizes = [2, 32], strides = [1, 1]} : vector<2x128xf32> to vector<2x32xf32>
    %85 = arith.negf %84 : vector<2x32xf32>
    %86 = math.exp %85 : vector<2x32xf32>
    %cst_30 = arith.constant 1.000000e+00 : f32
    %87 = vector.broadcast %cst_30 : f32 to vector<2x32xf32>
    %88 = arith.addf %87, %86 : vector<2x32xf32>
    %89 = arith.divf %87, %88 : vector<2x32xf32>
    %90 = arith.mulf %81, %34 : vector<2x32xf32>
    %91 = arith.mulf %75, %83 : vector<2x32xf32>
    %92 = arith.addf %90, %91 : vector<2x32xf32>
    %93 = math.tanh %92 : vector<2x32xf32>
    %94 = arith.mulf %89, %93 : vector<2x32xf32>
    %c1_31 = arith.constant 1 : index
    %c1_32 = arith.constant 1 : index
    %c0_33 = arith.constant 0 : index
    %c0_34 = arith.constant 0 : index
    %95 = vector.load %arg0[%c1_31, %c1_32, %c0_33, %c0_34] : memref<2x8x2x128xf32, #tpu.memory_space<vmem>>, vector<1x1x2x128xf32>
    %96 = vector.shape_cast %95 : vector<1x1x2x128xf32> to vector<2x128xf32>
    %cst_35 = arith.constant dense<0.000000e+00> : vector<2x128xf32>
    %97 = tpu.matmul %65, %3, %cst_35 {dimension_numbers = #tpu.dot_dimension_numbers<[1], [0], [0], [1], [0, 0, 1, 1], [], []>} : vector<2x32xf32>, vector<32x128xf32>, vector<2x128xf32> -> vector<2x128xf32>
    %98 = arith.addf %96, %97 : vector<2x128xf32>
    %99 = vector.extract_strided_slice %98 {offsets = [0, 0], sizes = [2, 32], strides = [1, 1]} : vector<2x128xf32> to vector<2x32xf32>
    %100 = arith.negf %99 : vector<2x32xf32>
    %101 = math.exp %100 : vector<2x32xf32>
    %cst_36 = arith.constant 1.000000e+00 : f32
    %102 = vector.broadcast %cst_36 : f32 to vector<2x32xf32>
    %103 = arith.addf %102, %101 : vector<2x32xf32>
    %104 = arith.divf %102, %103 : vector<2x32xf32>
    %105 = vector.extract_strided_slice %98 {offsets = [0, 32], sizes = [2, 32], strides = [1, 1]} : vector<2x128xf32> to vector<2x32xf32>
    %106 = arith.negf %105 : vector<2x32xf32>
    %107 = math.exp %106 : vector<2x32xf32>
    %cst_37 = arith.constant 1.000000e+00 : f32
    %108 = vector.broadcast %cst_37 : f32 to vector<2x32xf32>
    %109 = arith.addf %108, %107 : vector<2x32xf32>
    %110 = arith.divf %108, %109 : vector<2x32xf32>
    %111 = vector.extract_strided_slice %98 {offsets = [0, 64], sizes = [2, 32], strides = [1, 1]} : vector<2x128xf32> to vector<2x32xf32>
    %112 = math.tanh %111 : vector<2x32xf32>
    %113 = vector.extract_strided_slice %98 {offsets = [0, 96], sizes = [2, 32], strides = [1, 1]} : vector<2x128xf32> to vector<2x32xf32>
    %114 = arith.negf %113 : vector<2x32xf32>
    %115 = math.exp %114 : vector<2x32xf32>
    %cst_38 = arith.constant 1.000000e+00 : f32
    %116 = vector.broadcast %cst_38 : f32 to vector<2x32xf32>
    %117 = arith.addf %116, %115 : vector<2x32xf32>
    %118 = arith.divf %116, %117 : vector<2x32xf32>
    %119 = arith.mulf %110, %63 : vector<2x32xf32>
    %120 = arith.mulf %104, %112 : vector<2x32xf32>
    %121 = arith.addf %119, %120 : vector<2x32xf32>
    %122 = math.tanh %121 : vector<2x32xf32>
    %123 = arith.mulf %118, %122 : vector<2x32xf32>
    %c0_39 = arith.constant 0 : index
    %c2 = arith.constant 2 : index
    %c0_40 = arith.constant 0 : index
    %c0_41 = arith.constant 0 : index
    %124 = vector.load %arg0[%c0_39, %c2, %c0_40, %c0_41] : memref<2x8x2x128xf32, #tpu.memory_space<vmem>>, vector<1x1x2x128xf32>
    %125 = vector.shape_cast %124 : vector<1x1x2x128xf32> to vector<2x128xf32>
    %cst_42 = arith.constant dense<0.000000e+00> : vector<2x128xf32>
    %126 = tpu.matmul %94, %1, %cst_42 {dimension_numbers = #tpu.dot_dimension_numbers<[1], [0], [0], [1], [0, 0, 1, 1], [], []>} : vector<2x32xf32>, vector<32x128xf32>, vector<2x128xf32> -> vector<2x128xf32>
    %127 = arith.addf %125, %126 : vector<2x128xf32>
    %128 = vector.extract_strided_slice %127 {offsets = [0, 0], sizes = [2, 32], strides = [1, 1]} : vector<2x128xf32> to vector<2x32xf32>
    %129 = arith.negf %128 : vector<2x32xf32>
    %130 = math.exp %129 : vector<2x32xf32>
    %cst_43 = arith.constant 1.000000e+00 : f32
    %131 = vector.broadcast %cst_43 : f32 to vector<2x32xf32>
    %132 = arith.addf %131, %130 : vector<2x32xf32>
    %133 = arith.divf %131, %132 : vector<2x32xf32>
    %134 = vector.extract_strided_slice %127 {offsets = [0, 32], sizes = [2, 32], strides = [1, 1]} : vector<2x128xf32> to vector<2x32xf32>
    %135 = arith.negf %134 : vector<2x32xf32>
    %136 = math.exp %135 : vector<2x32xf32>
    %cst_44 = arith.constant 1.000000e+00 : f32
    %137 = vector.broadcast %cst_44 : f32 to vector<2x32xf32>
    %138 = arith.addf %137, %136 : vector<2x32xf32>
    %139 = arith.divf %137, %138 : vector<2x32xf32>
    %140 = vector.extract_strided_slice %127 {offsets = [0, 64], sizes = [2, 32], strides = [1, 1]} : vector<2x128xf32> to vector<2x32xf32>
    %141 = math.tanh %140 : vector<2x32xf32>
    %142 = vector.extract_strided_slice %127 {offsets = [0, 96], sizes = [2, 32], strides = [1, 1]} : vector<2x128xf32> to vector<2x32xf32>
    %143 = arith.negf %142 : vector<2x32xf32>
    %144 = math.exp %143 : vector<2x32xf32>
    %cst_45 = arith.constant 1.000000e+00 : f32
    %145 = vector.broadcast %cst_45 : f32 to vector<2x32xf32>
    %146 = arith.addf %145, %144 : vector<2x32xf32>
    %147 = arith.divf %145, %146 : vector<2x32xf32>
    %148 = arith.mulf %139, %92 : vector<2x32xf32>
    %149 = arith.mulf %133, %141 : vector<2x32xf32>
    %150 = arith.addf %148, %149 : vector<2x32xf32>
    %151 = math.tanh %150 : vector<2x32xf32>
    %152 = arith.mulf %147, %151 : vector<2x32xf32>
    %c1_46 = arith.constant 1 : index
    %c2_47 = arith.constant 2 : index
    %c0_48 = arith.constant 0 : index
    %c0_49 = arith.constant 0 : index
    %153 = vector.load %arg0[%c1_46, %c2_47, %c0_48, %c0_49] : memref<2x8x2x128xf32, #tpu.memory_space<vmem>>, vector<1x1x2x128xf32>
    %154 = vector.shape_cast %153 : vector<1x1x2x128xf32> to vector<2x128xf32>
    %cst_50 = arith.constant dense<0.000000e+00> : vector<2x128xf32>
    %155 = tpu.matmul %123, %3, %cst_50 {dimension_numbers = #tpu.dot_dimension_numbers<[1], [0], [0], [1], [0, 0, 1, 1], [], []>} : vector<2x32xf32>, vector<32x128xf32>, vector<2x128xf32> -> vector<2x128xf32>
    %156 = arith.addf %154, %155 : vector<2x128xf32>
    %157 = vector.extract_strided_slice %156 {offsets = [0, 0], sizes = [2, 32], strides = [1, 1]} : vector<2x128xf32> to vector<2x32xf32>
    %158 = arith.negf %157 : vector<2x32xf32>
    %159 = math.exp %158 : vector<2x32xf32>
    %cst_51 = arith.constant 1.000000e+00 : f32
    %160 = vector.broadcast %cst_51 : f32 to vector<2x32xf32>
    %161 = arith.addf %160, %159 : vector<2x32xf32>
    %162 = arith.divf %160, %161 : vector<2x32xf32>
    %163 = vector.extract_strided_slice %156 {offsets = [0, 32], sizes = [2, 32], strides = [1, 1]} : vector<2x128xf32> to vector<2x32xf32>
    %164 = arith.negf %163 : vector<2x32xf32>
    %165 = math.exp %164 : vector<2x32xf32>
    %cst_52 = arith.constant 1.000000e+00 : f32
    %166 = vector.broadcast %cst_52 : f32 to vector<2x32xf32>
    %167 = arith.addf %166, %165 : vector<2x32xf32>
    %168 = arith.divf %166, %167 : vector<2x32xf32>
    %169 = vector.extract_strided_slice %156 {offsets = [0, 64], sizes = [2, 32], strides = [1, 1]} : vector<2x128xf32> to vector<2x32xf32>
    %170 = math.tanh %169 : vector<2x32xf32>
    %171 = vector.extract_strided_slice %156 {offsets = [0, 96], sizes = [2, 32], strides = [1, 1]} : vector<2x128xf32> to vector<2x32xf32>
    %172 = arith.negf %171 : vector<2x32xf32>
    %173 = math.exp %172 : vector<2x32xf32>
    %cst_53 = arith.constant 1.000000e+00 : f32
    %174 = vector.broadcast %cst_53 : f32 to vector<2x32xf32>
    %175 = arith.addf %174, %173 : vector<2x32xf32>
    %176 = arith.divf %174, %175 : vector<2x32xf32>
    %177 = arith.mulf %168, %121 : vector<2x32xf32>
    %178 = arith.mulf %162, %170 : vector<2x32xf32>
    %179 = arith.addf %177, %178 : vector<2x32xf32>
    %180 = math.tanh %179 : vector<2x32xf32>
    %181 = arith.mulf %176, %180 : vector<2x32xf32>
    %c0_54 = arith.constant 0 : index
    %c3 = arith.constant 3 : index
    %c0_55 = arith.constant 0 : index
    %c0_56 = arith.constant 0 : index
    %182 = vector.load %arg0[%c0_54, %c3, %c0_55, %c0_56] : memref<2x8x2x128xf32, #tpu.memory_space<vmem>>, vector<1x1x2x128xf32>
    %183 = vector.shape_cast %182 : vector<1x1x2x128xf32> to vector<2x128xf32>
    %cst_57 = arith.constant dense<0.000000e+00> : vector<2x128xf32>
    %184 = tpu.matmul %152, %1, %cst_57 {dimension_numbers = #tpu.dot_dimension_numbers<[1], [0], [0], [1], [0, 0, 1, 1], [], []>} : vector<2x32xf32>, vector<32x128xf32>, vector<2x128xf32> -> vector<2x128xf32>
    %185 = arith.addf %183, %184 : vector<2x128xf32>
    %186 = vector.extract_strided_slice %185 {offsets = [0, 0], sizes = [2, 32], strides = [1, 1]} : vector<2x128xf32> to vector<2x32xf32>
    %187 = arith.negf %186 : vector<2x32xf32>
    %188 = math.exp %187 : vector<2x32xf32>
    %cst_58 = arith.constant 1.000000e+00 : f32
    %189 = vector.broadcast %cst_58 : f32 to vector<2x32xf32>
    %190 = arith.addf %189, %188 : vector<2x32xf32>
    %191 = arith.divf %189, %190 : vector<2x32xf32>
    %192 = vector.extract_strided_slice %185 {offsets = [0, 32], sizes = [2, 32], strides = [1, 1]} : vector<2x128xf32> to vector<2x32xf32>
    %193 = arith.negf %192 : vector<2x32xf32>
    %194 = math.exp %193 : vector<2x32xf32>
    %cst_59 = arith.constant 1.000000e+00 : f32
    %195 = vector.broadcast %cst_59 : f32 to vector<2x32xf32>
    %196 = arith.addf %195, %194 : vector<2x32xf32>
    %197 = arith.divf %195, %196 : vector<2x32xf32>
    %198 = vector.extract_strided_slice %185 {offsets = [0, 64], sizes = [2, 32], strides = [1, 1]} : vector<2x128xf32> to vector<2x32xf32>
    %199 = math.tanh %198 : vector<2x32xf32>
    %200 = vector.extract_strided_slice %185 {offsets = [0, 96], sizes = [2, 32], strides = [1, 1]} : vector<2x128xf32> to vector<2x32xf32>
    %201 = arith.negf %200 : vector<2x32xf32>
    %202 = math.exp %201 : vector<2x32xf32>
    %cst_60 = arith.constant 1.000000e+00 : f32
    %203 = vector.broadcast %cst_60 : f32 to vector<2x32xf32>
    %204 = arith.addf %203, %202 : vector<2x32xf32>
    %205 = arith.divf %203, %204 : vector<2x32xf32>
    %206 = arith.mulf %197, %150 : vector<2x32xf32>
    %207 = arith.mulf %191, %199 : vector<2x32xf32>
    %208 = arith.addf %206, %207 : vector<2x32xf32>
    %209 = math.tanh %208 : vector<2x32xf32>
    %210 = arith.mulf %205, %209 : vector<2x32xf32>
    %c1_61 = arith.constant 1 : index
    %c3_62 = arith.constant 3 : index
    %c0_63 = arith.constant 0 : index
    %c0_64 = arith.constant 0 : index
    %211 = vector.load %arg0[%c1_61, %c3_62, %c0_63, %c0_64] : memref<2x8x2x128xf32, #tpu.memory_space<vmem>>, vector<1x1x2x128xf32>
    %212 = vector.shape_cast %211 : vector<1x1x2x128xf32> to vector<2x128xf32>
    %cst_65 = arith.constant dense<0.000000e+00> : vector<2x128xf32>
    %213 = tpu.matmul %181, %3, %cst_65 {dimension_numbers = #tpu.dot_dimension_numbers<[1], [0], [0], [1], [0, 0, 1, 1], [], []>} : vector<2x32xf32>, vector<32x128xf32>, vector<2x128xf32> -> vector<2x128xf32>
    %214 = arith.addf %212, %213 : vector<2x128xf32>
    %215 = vector.extract_strided_slice %214 {offsets = [0, 0], sizes = [2, 32], strides = [1, 1]} : vector<2x128xf32> to vector<2x32xf32>
    %216 = arith.negf %215 : vector<2x32xf32>
    %217 = math.exp %216 : vector<2x32xf32>
    %cst_66 = arith.constant 1.000000e+00 : f32
    %218 = vector.broadcast %cst_66 : f32 to vector<2x32xf32>
    %219 = arith.addf %218, %217 : vector<2x32xf32>
    %220 = arith.divf %218, %219 : vector<2x32xf32>
    %221 = vector.extract_strided_slice %214 {offsets = [0, 32], sizes = [2, 32], strides = [1, 1]} : vector<2x128xf32> to vector<2x32xf32>
    %222 = arith.negf %221 : vector<2x32xf32>
    %223 = math.exp %222 : vector<2x32xf32>
    %cst_67 = arith.constant 1.000000e+00 : f32
    %224 = vector.broadcast %cst_67 : f32 to vector<2x32xf32>
    %225 = arith.addf %224, %223 : vector<2x32xf32>
    %226 = arith.divf %224, %225 : vector<2x32xf32>
    %227 = vector.extract_strided_slice %214 {offsets = [0, 64], sizes = [2, 32], strides = [1, 1]} : vector<2x128xf32> to vector<2x32xf32>
    %228 = math.tanh %227 : vector<2x32xf32>
    %229 = vector.extract_strided_slice %214 {offsets = [0, 96], sizes = [2, 32], strides = [1, 1]} : vector<2x128xf32> to vector<2x32xf32>
    %230 = arith.negf %229 : vector<2x32xf32>
    %231 = math.exp %230 : vector<2x32xf32>
    %cst_68 = arith.constant 1.000000e+00 : f32
    %232 = vector.broadcast %cst_68 : f32 to vector<2x32xf32>
    %233 = arith.addf %232, %231 : vector<2x32xf32>
    %234 = arith.divf %232, %233 : vector<2x32xf32>
    %235 = arith.mulf %226, %179 : vector<2x32xf32>
    %236 = arith.mulf %220, %228 : vector<2x32xf32>
    %237 = arith.addf %235, %236 : vector<2x32xf32>
    %238 = math.tanh %237 : vector<2x32xf32>
    %239 = arith.mulf %234, %238 : vector<2x32xf32>
    %c0_69 = arith.constant 0 : index
    %c4 = arith.constant 4 : index
    %c0_70 = arith.constant 0 : index
    %c0_71 = arith.constant 0 : index
    %240 = vector.load %arg0[%c0_69, %c4, %c0_70, %c0_71] : memref<2x8x2x128xf32, #tpu.memory_space<vmem>>, vector<1x1x2x128xf32>
    %241 = vector.shape_cast %240 : vector<1x1x2x128xf32> to vector<2x128xf32>
    %cst_72 = arith.constant dense<0.000000e+00> : vector<2x128xf32>
    %242 = tpu.matmul %210, %1, %cst_72 {dimension_numbers = #tpu.dot_dimension_numbers<[1], [0], [0], [1], [0, 0, 1, 1], [], []>} : vector<2x32xf32>, vector<32x128xf32>, vector<2x128xf32> -> vector<2x128xf32>
    %243 = arith.addf %241, %242 : vector<2x128xf32>
    %244 = vector.extract_strided_slice %243 {offsets = [0, 0], sizes = [2, 32], strides = [1, 1]} : vector<2x128xf32> to vector<2x32xf32>
    %245 = arith.negf %244 : vector<2x32xf32>
    %246 = math.exp %245 : vector<2x32xf32>
    %cst_73 = arith.constant 1.000000e+00 : f32
    %247 = vector.broadcast %cst_73 : f32 to vector<2x32xf32>
    %248 = arith.addf %247, %246 : vector<2x32xf32>
    %249 = arith.divf %247, %248 : vector<2x32xf32>
    %250 = vector.extract_strided_slice %243 {offsets = [0, 32], sizes = [2, 32], strides = [1, 1]} : vector<2x128xf32> to vector<2x32xf32>
    %251 = arith.negf %250 : vector<2x32xf32>
    %252 = math.exp %251 : vector<2x32xf32>
    %cst_74 = arith.constant 1.000000e+00 : f32
    %253 = vector.broadcast %cst_74 : f32 to vector<2x32xf32>
    %254 = arith.addf %253, %252 : vector<2x32xf32>
    %255 = arith.divf %253, %254 : vector<2x32xf32>
    %256 = vector.extract_strided_slice %243 {offsets = [0, 64], sizes = [2, 32], strides = [1, 1]} : vector<2x128xf32> to vector<2x32xf32>
    %257 = math.tanh %256 : vector<2x32xf32>
    %258 = vector.extract_strided_slice %243 {offsets = [0, 96], sizes = [2, 32], strides = [1, 1]} : vector<2x128xf32> to vector<2x32xf32>
    %259 = arith.negf %258 : vector<2x32xf32>
    %260 = math.exp %259 : vector<2x32xf32>
    %cst_75 = arith.constant 1.000000e+00 : f32
    %261 = vector.broadcast %cst_75 : f32 to vector<2x32xf32>
    %262 = arith.addf %261, %260 : vector<2x32xf32>
    %263 = arith.divf %261, %262 : vector<2x32xf32>
    %264 = arith.mulf %255, %208 : vector<2x32xf32>
    %265 = arith.mulf %249, %257 : vector<2x32xf32>
    %266 = arith.addf %264, %265 : vector<2x32xf32>
    %267 = math.tanh %266 : vector<2x32xf32>
    %268 = arith.mulf %263, %267 : vector<2x32xf32>
    %c1_76 = arith.constant 1 : index
    %c4_77 = arith.constant 4 : index
    %c0_78 = arith.constant 0 : index
    %c0_79 = arith.constant 0 : index
    %269 = vector.load %arg0[%c1_76, %c4_77, %c0_78, %c0_79] : memref<2x8x2x128xf32, #tpu.memory_space<vmem>>, vector<1x1x2x128xf32>
    %270 = vector.shape_cast %269 : vector<1x1x2x128xf32> to vector<2x128xf32>
    %cst_80 = arith.constant dense<0.000000e+00> : vector<2x128xf32>
    %271 = tpu.matmul %239, %3, %cst_80 {dimension_numbers = #tpu.dot_dimension_numbers<[1], [0], [0], [1], [0, 0, 1, 1], [], []>} : vector<2x32xf32>, vector<32x128xf32>, vector<2x128xf32> -> vector<2x128xf32>
    %272 = arith.addf %270, %271 : vector<2x128xf32>
    %273 = vector.extract_strided_slice %272 {offsets = [0, 0], sizes = [2, 32], strides = [1, 1]} : vector<2x128xf32> to vector<2x32xf32>
    %274 = arith.negf %273 : vector<2x32xf32>
    %275 = math.exp %274 : vector<2x32xf32>
    %cst_81 = arith.constant 1.000000e+00 : f32
    %276 = vector.broadcast %cst_81 : f32 to vector<2x32xf32>
    %277 = arith.addf %276, %275 : vector<2x32xf32>
    %278 = arith.divf %276, %277 : vector<2x32xf32>
    %279 = vector.extract_strided_slice %272 {offsets = [0, 32], sizes = [2, 32], strides = [1, 1]} : vector<2x128xf32> to vector<2x32xf32>
    %280 = arith.negf %279 : vector<2x32xf32>
    %281 = math.exp %280 : vector<2x32xf32>
    %cst_82 = arith.constant 1.000000e+00 : f32
    %282 = vector.broadcast %cst_82 : f32 to vector<2x32xf32>
    %283 = arith.addf %282, %281 : vector<2x32xf32>
    %284 = arith.divf %282, %283 : vector<2x32xf32>
    %285 = vector.extract_strided_slice %272 {offsets = [0, 64], sizes = [2, 32], strides = [1, 1]} : vector<2x128xf32> to vector<2x32xf32>
    %286 = math.tanh %285 : vector<2x32xf32>
    %287 = vector.extract_strided_slice %272 {offsets = [0, 96], sizes = [2, 32], strides = [1, 1]} : vector<2x128xf32> to vector<2x32xf32>
    %288 = arith.negf %287 : vector<2x32xf32>
    %289 = math.exp %288 : vector<2x32xf32>
    %cst_83 = arith.constant 1.000000e+00 : f32
    %290 = vector.broadcast %cst_83 : f32 to vector<2x32xf32>
    %291 = arith.addf %290, %289 : vector<2x32xf32>
    %292 = arith.divf %290, %291 : vector<2x32xf32>
    %293 = arith.mulf %284, %237 : vector<2x32xf32>
    %294 = arith.mulf %278, %286 : vector<2x32xf32>
    %295 = arith.addf %293, %294 : vector<2x32xf32>
    %296 = math.tanh %295 : vector<2x32xf32>
    %297 = arith.mulf %292, %296 : vector<2x32xf32>
    %c0_84 = arith.constant 0 : index
    %c5 = arith.constant 5 : index
    %c0_85 = arith.constant 0 : index
    %c0_86 = arith.constant 0 : index
    %298 = vector.load %arg0[%c0_84, %c5, %c0_85, %c0_86] : memref<2x8x2x128xf32, #tpu.memory_space<vmem>>, vector<1x1x2x128xf32>
    %299 = vector.shape_cast %298 : vector<1x1x2x128xf32> to vector<2x128xf32>
    %cst_87 = arith.constant dense<0.000000e+00> : vector<2x128xf32>
    %300 = tpu.matmul %268, %1, %cst_87 {dimension_numbers = #tpu.dot_dimension_numbers<[1], [0], [0], [1], [0, 0, 1, 1], [], []>} : vector<2x32xf32>, vector<32x128xf32>, vector<2x128xf32> -> vector<2x128xf32>
    %301 = arith.addf %299, %300 : vector<2x128xf32>
    %302 = vector.extract_strided_slice %301 {offsets = [0, 0], sizes = [2, 32], strides = [1, 1]} : vector<2x128xf32> to vector<2x32xf32>
    %303 = arith.negf %302 : vector<2x32xf32>
    %304 = math.exp %303 : vector<2x32xf32>
    %cst_88 = arith.constant 1.000000e+00 : f32
    %305 = vector.broadcast %cst_88 : f32 to vector<2x32xf32>
    %306 = arith.addf %305, %304 : vector<2x32xf32>
    %307 = arith.divf %305, %306 : vector<2x32xf32>
    %308 = vector.extract_strided_slice %301 {offsets = [0, 32], sizes = [2, 32], strides = [1, 1]} : vector<2x128xf32> to vector<2x32xf32>
    %309 = arith.negf %308 : vector<2x32xf32>
    %310 = math.exp %309 : vector<2x32xf32>
    %cst_89 = arith.constant 1.000000e+00 : f32
    %311 = vector.broadcast %cst_89 : f32 to vector<2x32xf32>
    %312 = arith.addf %311, %310 : vector<2x32xf32>
    %313 = arith.divf %311, %312 : vector<2x32xf32>
    %314 = vector.extract_strided_slice %301 {offsets = [0, 64], sizes = [2, 32], strides = [1, 1]} : vector<2x128xf32> to vector<2x32xf32>
    %315 = math.tanh %314 : vector<2x32xf32>
    %316 = vector.extract_strided_slice %301 {offsets = [0, 96], sizes = [2, 32], strides = [1, 1]} : vector<2x128xf32> to vector<2x32xf32>
    %317 = arith.negf %316 : vector<2x32xf32>
    %318 = math.exp %317 : vector<2x32xf32>
    %cst_90 = arith.constant 1.000000e+00 : f32
    %319 = vector.broadcast %cst_90 : f32 to vector<2x32xf32>
    %320 = arith.addf %319, %318 : vector<2x32xf32>
    %321 = arith.divf %319, %320 : vector<2x32xf32>
    %322 = arith.mulf %313, %266 : vector<2x32xf32>
    %323 = arith.mulf %307, %315 : vector<2x32xf32>
    %324 = arith.addf %322, %323 : vector<2x32xf32>
    %325 = math.tanh %324 : vector<2x32xf32>
    %326 = arith.mulf %321, %325 : vector<2x32xf32>
    %c1_91 = arith.constant 1 : index
    %c5_92 = arith.constant 5 : index
    %c0_93 = arith.constant 0 : index
    %c0_94 = arith.constant 0 : index
    %327 = vector.load %arg0[%c1_91, %c5_92, %c0_93, %c0_94] : memref<2x8x2x128xf32, #tpu.memory_space<vmem>>, vector<1x1x2x128xf32>
    %328 = vector.shape_cast %327 : vector<1x1x2x128xf32> to vector<2x128xf32>
    %cst_95 = arith.constant dense<0.000000e+00> : vector<2x128xf32>
    %329 = tpu.matmul %297, %3, %cst_95 {dimension_numbers = #tpu.dot_dimension_numbers<[1], [0], [0], [1], [0, 0, 1, 1], [], []>} : vector<2x32xf32>, vector<32x128xf32>, vector<2x128xf32> -> vector<2x128xf32>
    %330 = arith.addf %328, %329 : vector<2x128xf32>
    %331 = vector.extract_strided_slice %330 {offsets = [0, 0], sizes = [2, 32], strides = [1, 1]} : vector<2x128xf32> to vector<2x32xf32>
    %332 = arith.negf %331 : vector<2x32xf32>
    %333 = math.exp %332 : vector<2x32xf32>
    %cst_96 = arith.constant 1.000000e+00 : f32
    %334 = vector.broadcast %cst_96 : f32 to vector<2x32xf32>
    %335 = arith.addf %334, %333 : vector<2x32xf32>
    %336 = arith.divf %334, %335 : vector<2x32xf32>
    %337 = vector.extract_strided_slice %330 {offsets = [0, 32], sizes = [2, 32], strides = [1, 1]} : vector<2x128xf32> to vector<2x32xf32>
    %338 = arith.negf %337 : vector<2x32xf32>
    %339 = math.exp %338 : vector<2x32xf32>
    %cst_97 = arith.constant 1.000000e+00 : f32
    %340 = vector.broadcast %cst_97 : f32 to vector<2x32xf32>
    %341 = arith.addf %340, %339 : vector<2x32xf32>
    %342 = arith.divf %340, %341 : vector<2x32xf32>
    %343 = vector.extract_strided_slice %330 {offsets = [0, 64], sizes = [2, 32], strides = [1, 1]} : vector<2x128xf32> to vector<2x32xf32>
    %344 = math.tanh %343 : vector<2x32xf32>
    %345 = vector.extract_strided_slice %330 {offsets = [0, 96], sizes = [2, 32], strides = [1, 1]} : vector<2x128xf32> to vector<2x32xf32>
    %346 = arith.negf %345 : vector<2x32xf32>
    %347 = math.exp %346 : vector<2x32xf32>
    %cst_98 = arith.constant 1.000000e+00 : f32
    %348 = vector.broadcast %cst_98 : f32 to vector<2x32xf32>
    %349 = arith.addf %348, %347 : vector<2x32xf32>
    %350 = arith.divf %348, %349 : vector<2x32xf32>
    %351 = arith.mulf %342, %295 : vector<2x32xf32>
    %352 = arith.mulf %336, %344 : vector<2x32xf32>
    %353 = arith.addf %351, %352 : vector<2x32xf32>
    %354 = math.tanh %353 : vector<2x32xf32>
    %355 = arith.mulf %350, %354 : vector<2x32xf32>
    %c0_99 = arith.constant 0 : index
    %c6 = arith.constant 6 : index
    %c0_100 = arith.constant 0 : index
    %c0_101 = arith.constant 0 : index
    %356 = vector.load %arg0[%c0_99, %c6, %c0_100, %c0_101] : memref<2x8x2x128xf32, #tpu.memory_space<vmem>>, vector<1x1x2x128xf32>
    %357 = vector.shape_cast %356 : vector<1x1x2x128xf32> to vector<2x128xf32>
    %cst_102 = arith.constant dense<0.000000e+00> : vector<2x128xf32>
    %358 = tpu.matmul %326, %1, %cst_102 {dimension_numbers = #tpu.dot_dimension_numbers<[1], [0], [0], [1], [0, 0, 1, 1], [], []>} : vector<2x32xf32>, vector<32x128xf32>, vector<2x128xf32> -> vector<2x128xf32>
    %359 = arith.addf %357, %358 : vector<2x128xf32>
    %360 = vector.extract_strided_slice %359 {offsets = [0, 0], sizes = [2, 32], strides = [1, 1]} : vector<2x128xf32> to vector<2x32xf32>
    %361 = arith.negf %360 : vector<2x32xf32>
    %362 = math.exp %361 : vector<2x32xf32>
    %cst_103 = arith.constant 1.000000e+00 : f32
    %363 = vector.broadcast %cst_103 : f32 to vector<2x32xf32>
    %364 = arith.addf %363, %362 : vector<2x32xf32>
    %365 = arith.divf %363, %364 : vector<2x32xf32>
    %366 = vector.extract_strided_slice %359 {offsets = [0, 32], sizes = [2, 32], strides = [1, 1]} : vector<2x128xf32> to vector<2x32xf32>
    %367 = arith.negf %366 : vector<2x32xf32>
    %368 = math.exp %367 : vector<2x32xf32>
    %cst_104 = arith.constant 1.000000e+00 : f32
    %369 = vector.broadcast %cst_104 : f32 to vector<2x32xf32>
    %370 = arith.addf %369, %368 : vector<2x32xf32>
    %371 = arith.divf %369, %370 : vector<2x32xf32>
    %372 = vector.extract_strided_slice %359 {offsets = [0, 64], sizes = [2, 32], strides = [1, 1]} : vector<2x128xf32> to vector<2x32xf32>
    %373 = math.tanh %372 : vector<2x32xf32>
    %374 = vector.extract_strided_slice %359 {offsets = [0, 96], sizes = [2, 32], strides = [1, 1]} : vector<2x128xf32> to vector<2x32xf32>
    %375 = arith.negf %374 : vector<2x32xf32>
    %376 = math.exp %375 : vector<2x32xf32>
    %cst_105 = arith.constant 1.000000e+00 : f32
    %377 = vector.broadcast %cst_105 : f32 to vector<2x32xf32>
    %378 = arith.addf %377, %376 : vector<2x32xf32>
    %379 = arith.divf %377, %378 : vector<2x32xf32>
    %380 = arith.mulf %371, %324 : vector<2x32xf32>
    %381 = arith.mulf %365, %373 : vector<2x32xf32>
    %382 = arith.addf %380, %381 : vector<2x32xf32>
    %383 = math.tanh %382 : vector<2x32xf32>
    %384 = arith.mulf %379, %383 : vector<2x32xf32>
    %c1_106 = arith.constant 1 : index
    %c6_107 = arith.constant 6 : index
    %c0_108 = arith.constant 0 : index
    %c0_109 = arith.constant 0 : index
    %385 = vector.load %arg0[%c1_106, %c6_107, %c0_108, %c0_109] : memref<2x8x2x128xf32, #tpu.memory_space<vmem>>, vector<1x1x2x128xf32>
    %386 = vector.shape_cast %385 : vector<1x1x2x128xf32> to vector<2x128xf32>
    %cst_110 = arith.constant dense<0.000000e+00> : vector<2x128xf32>
    %387 = tpu.matmul %355, %3, %cst_110 {dimension_numbers = #tpu.dot_dimension_numbers<[1], [0], [0], [1], [0, 0, 1, 1], [], []>} : vector<2x32xf32>, vector<32x128xf32>, vector<2x128xf32> -> vector<2x128xf32>
    %388 = arith.addf %386, %387 : vector<2x128xf32>
    %389 = vector.extract_strided_slice %388 {offsets = [0, 0], sizes = [2, 32], strides = [1, 1]} : vector<2x128xf32> to vector<2x32xf32>
    %390 = arith.negf %389 : vector<2x32xf32>
    %391 = math.exp %390 : vector<2x32xf32>
    %cst_111 = arith.constant 1.000000e+00 : f32
    %392 = vector.broadcast %cst_111 : f32 to vector<2x32xf32>
    %393 = arith.addf %392, %391 : vector<2x32xf32>
    %394 = arith.divf %392, %393 : vector<2x32xf32>
    %395 = vector.extract_strided_slice %388 {offsets = [0, 32], sizes = [2, 32], strides = [1, 1]} : vector<2x128xf32> to vector<2x32xf32>
    %396 = arith.negf %395 : vector<2x32xf32>
    %397 = math.exp %396 : vector<2x32xf32>
    %cst_112 = arith.constant 1.000000e+00 : f32
    %398 = vector.broadcast %cst_112 : f32 to vector<2x32xf32>
    %399 = arith.addf %398, %397 : vector<2x32xf32>
    %400 = arith.divf %398, %399 : vector<2x32xf32>
    %401 = vector.extract_strided_slice %388 {offsets = [0, 64], sizes = [2, 32], strides = [1, 1]} : vector<2x128xf32> to vector<2x32xf32>
    %402 = math.tanh %401 : vector<2x32xf32>
    %403 = vector.extract_strided_slice %388 {offsets = [0, 96], sizes = [2, 32], strides = [1, 1]} : vector<2x128xf32> to vector<2x32xf32>
    %404 = arith.negf %403 : vector<2x32xf32>
    %405 = math.exp %404 : vector<2x32xf32>
    %cst_113 = arith.constant 1.000000e+00 : f32
    %406 = vector.broadcast %cst_113 : f32 to vector<2x32xf32>
    %407 = arith.addf %406, %405 : vector<2x32xf32>
    %408 = arith.divf %406, %407 : vector<2x32xf32>
    %409 = arith.mulf %400, %353 : vector<2x32xf32>
    %410 = arith.mulf %394, %402 : vector<2x32xf32>
    %411 = arith.addf %409, %410 : vector<2x32xf32>
    %412 = math.tanh %411 : vector<2x32xf32>
    %413 = arith.mulf %408, %412 : vector<2x32xf32>
    %c0_114 = arith.constant 0 : index
    %c7 = arith.constant 7 : index
    %c0_115 = arith.constant 0 : index
    %c0_116 = arith.constant 0 : index
    %414 = vector.load %arg0[%c0_114, %c7, %c0_115, %c0_116] : memref<2x8x2x128xf32, #tpu.memory_space<vmem>>, vector<1x1x2x128xf32>
    %415 = vector.shape_cast %414 : vector<1x1x2x128xf32> to vector<2x128xf32>
    %cst_117 = arith.constant dense<0.000000e+00> : vector<2x128xf32>
    %416 = tpu.matmul %384, %1, %cst_117 {dimension_numbers = #tpu.dot_dimension_numbers<[1], [0], [0], [1], [0, 0, 1, 1], [], []>} : vector<2x32xf32>, vector<32x128xf32>, vector<2x128xf32> -> vector<2x128xf32>
    %417 = arith.addf %415, %416 : vector<2x128xf32>
    %418 = vector.extract_strided_slice %417 {offsets = [0, 0], sizes = [2, 32], strides = [1, 1]} : vector<2x128xf32> to vector<2x32xf32>
    %419 = arith.negf %418 : vector<2x32xf32>
    %420 = math.exp %419 : vector<2x32xf32>
    %cst_118 = arith.constant 1.000000e+00 : f32
    %421 = vector.broadcast %cst_118 : f32 to vector<2x32xf32>
    %422 = arith.addf %421, %420 : vector<2x32xf32>
    %423 = arith.divf %421, %422 : vector<2x32xf32>
    %424 = vector.extract_strided_slice %417 {offsets = [0, 32], sizes = [2, 32], strides = [1, 1]} : vector<2x128xf32> to vector<2x32xf32>
    %425 = arith.negf %424 : vector<2x32xf32>
    %426 = math.exp %425 : vector<2x32xf32>
    %cst_119 = arith.constant 1.000000e+00 : f32
    %427 = vector.broadcast %cst_119 : f32 to vector<2x32xf32>
    %428 = arith.addf %427, %426 : vector<2x32xf32>
    %429 = arith.divf %427, %428 : vector<2x32xf32>
    %430 = vector.extract_strided_slice %417 {offsets = [0, 64], sizes = [2, 32], strides = [1, 1]} : vector<2x128xf32> to vector<2x32xf32>
    %431 = math.tanh %430 : vector<2x32xf32>
    %432 = vector.extract_strided_slice %417 {offsets = [0, 96], sizes = [2, 32], strides = [1, 1]} : vector<2x128xf32> to vector<2x32xf32>
    %433 = arith.negf %432 : vector<2x32xf32>
    %434 = math.exp %433 : vector<2x32xf32>
    %cst_120 = arith.constant 1.000000e+00 : f32
    %435 = vector.broadcast %cst_120 : f32 to vector<2x32xf32>
    %436 = arith.addf %435, %434 : vector<2x32xf32>
    %437 = arith.divf %435, %436 : vector<2x32xf32>
    %438 = arith.mulf %429, %382 : vector<2x32xf32>
    %439 = arith.mulf %423, %431 : vector<2x32xf32>
    %440 = arith.addf %438, %439 : vector<2x32xf32>
    %441 = math.tanh %440 : vector<2x32xf32>
    %442 = arith.mulf %437, %441 : vector<2x32xf32>
    %c1_121 = arith.constant 1 : index
    %c7_122 = arith.constant 7 : index
    %c0_123 = arith.constant 0 : index
    %c0_124 = arith.constant 0 : index
    %443 = vector.load %arg0[%c1_121, %c7_122, %c0_123, %c0_124] : memref<2x8x2x128xf32, #tpu.memory_space<vmem>>, vector<1x1x2x128xf32>
    %444 = vector.shape_cast %443 : vector<1x1x2x128xf32> to vector<2x128xf32>
    %cst_125 = arith.constant dense<0.000000e+00> : vector<2x128xf32>
    %445 = tpu.matmul %413, %3, %cst_125 {dimension_numbers = #tpu.dot_dimension_numbers<[1], [0], [0], [1], [0, 0, 1, 1], [], []>} : vector<2x32xf32>, vector<32x128xf32>, vector<2x128xf32> -> vector<2x128xf32>
    %446 = arith.addf %444, %445 : vector<2x128xf32>
    %447 = vector.extract_strided_slice %446 {offsets = [0, 0], sizes = [2, 32], strides = [1, 1]} : vector<2x128xf32> to vector<2x32xf32>
    %448 = arith.negf %447 : vector<2x32xf32>
    %449 = math.exp %448 : vector<2x32xf32>
    %cst_126 = arith.constant 1.000000e+00 : f32
    %450 = vector.broadcast %cst_126 : f32 to vector<2x32xf32>
    %451 = arith.addf %450, %449 : vector<2x32xf32>
    %452 = arith.divf %450, %451 : vector<2x32xf32>
    %453 = vector.extract_strided_slice %446 {offsets = [0, 32], sizes = [2, 32], strides = [1, 1]} : vector<2x128xf32> to vector<2x32xf32>
    %454 = arith.negf %453 : vector<2x32xf32>
    %455 = math.exp %454 : vector<2x32xf32>
    %cst_127 = arith.constant 1.000000e+00 : f32
    %456 = vector.broadcast %cst_127 : f32 to vector<2x32xf32>
    %457 = arith.addf %456, %455 : vector<2x32xf32>
    %458 = arith.divf %456, %457 : vector<2x32xf32>
    %459 = vector.extract_strided_slice %446 {offsets = [0, 64], sizes = [2, 32], strides = [1, 1]} : vector<2x128xf32> to vector<2x32xf32>
    %460 = math.tanh %459 : vector<2x32xf32>
    %461 = vector.extract_strided_slice %446 {offsets = [0, 96], sizes = [2, 32], strides = [1, 1]} : vector<2x128xf32> to vector<2x32xf32>
    %462 = arith.negf %461 : vector<2x32xf32>
    %463 = math.exp %462 : vector<2x32xf32>
    %cst_128 = arith.constant 1.000000e+00 : f32
    %464 = vector.broadcast %cst_128 : f32 to vector<2x32xf32>
    %465 = arith.addf %464, %463 : vector<2x32xf32>
    %466 = arith.divf %464, %465 : vector<2x32xf32>
    %467 = arith.mulf %458, %411 : vector<2x32xf32>
    %468 = arith.mulf %452, %460 : vector<2x32xf32>
    %469 = arith.addf %467, %468 : vector<2x32xf32>
    %470 = math.tanh %469 : vector<2x32xf32>
    %471 = arith.mulf %466, %470 : vector<2x32xf32>
    %472 = vector.shape_cast %36 : vector<2x32xf32> to vector<1x2x32xf32>
    %473 = vector.shape_cast %94 : vector<2x32xf32> to vector<1x2x32xf32>
    %474 = vector.shape_cast %152 : vector<2x32xf32> to vector<1x2x32xf32>
    %475 = vector.shape_cast %210 : vector<2x32xf32> to vector<1x2x32xf32>
    %476 = vector.shape_cast %268 : vector<2x32xf32> to vector<1x2x32xf32>
    %477 = vector.shape_cast %326 : vector<2x32xf32> to vector<1x2x32xf32>
    %478 = vector.shape_cast %384 : vector<2x32xf32> to vector<1x2x32xf32>
    %479 = vector.shape_cast %442 : vector<2x32xf32> to vector<1x2x32xf32>
    %480 = tpu.concatenate %472, %473, %474, %475, %476, %477, %478, %479 in 0 : vector<1x2x32xf32>, vector<1x2x32xf32>, vector<1x2x32xf32>, vector<1x2x32xf32>, vector<1x2x32xf32>, vector<1x2x32xf32>, vector<1x2x32xf32>, vector<1x2x32xf32> -> vector<8x2x32xf32>
    %481 = vector.shape_cast %471 : vector<2x32xf32> to vector<1x2x32xf32>
    %482 = vector.shape_cast %413 : vector<2x32xf32> to vector<1x2x32xf32>
    %483 = vector.shape_cast %355 : vector<2x32xf32> to vector<1x2x32xf32>
    %484 = vector.shape_cast %297 : vector<2x32xf32> to vector<1x2x32xf32>
    %485 = vector.shape_cast %239 : vector<2x32xf32> to vector<1x2x32xf32>
    %486 = vector.shape_cast %181 : vector<2x32xf32> to vector<1x2x32xf32>
    %487 = vector.shape_cast %123 : vector<2x32xf32> to vector<1x2x32xf32>
    %488 = vector.shape_cast %65 : vector<2x32xf32> to vector<1x2x32xf32>
    %489 = tpu.concatenate %481, %482, %483, %484, %485, %486, %487, %488 in 0 : vector<1x2x32xf32>, vector<1x2x32xf32>, vector<1x2x32xf32>, vector<1x2x32xf32>, vector<1x2x32xf32>, vector<1x2x32xf32>, vector<1x2x32xf32>, vector<1x2x32xf32> -> vector<8x2x32xf32>
    %490 = tpu.concatenate %480, %489 in 2 : vector<8x2x32xf32>, vector<8x2x32xf32> -> vector<8x2x64xf32>
    %c0_129 = arith.constant 0 : index
    %c0_130 = arith.constant 0 : index
    %c0_131 = arith.constant 0 : index
    %491 = vector.load %arg2[%c0_129, %c0_130, %c0_131] : memref<8x2x64xf32, #tpu.memory_space<vmem>>, vector<8x2x64xf32>
    tpu.vector_store %arg2[%c0_129, %c0_130, %c0_131], %490 {strides = array<i32>} : memref<8x2x64xf32, #tpu.memory_space<vmem>>, vector<8x2x64xf32>,
    return
  }
}

</mosaic_0001>

<bundles_post_ra>
// kernel: _rnn_forward.2
= control target key start
LH: loop header
LB: loop body
LE: loop exit
PB: predicated region body
PF: predicated region fallthrough
CT: control target
= control target key end

     0   :  { %v2139_v0 = vmov 0.0   ;;  %vm2140_vm0 = vmmov 0   ;;  %s2141_s28 = smov 64   ;;  %s2142_s29 = smov 32   ;;  %vm21_vm1 = vcmask 261120   ;;  %vm1689_vm2 = vcmask 517120   ;;  %s2633_s1 = inlined_call_operand.vmem [shape: f32[2,32,128], index: 1, kind: input, shape index: {}]   ;;  %s2634_s0 = inlined_call_operand.vmem [shape: f32[2,8,2,128], index: 0, kind: input, shape index: {}]   ;;  %s2635_s2 = inlined_call_operand.vmem [shape: f32[8,2,64], index: 2, kind: output, shape index: {}]  }
   0x1   :  { %1831 = vmatprep.subr.mxu0 %v2139_v0  ;;  %v2162_v1 = vld [vmem:[%s2633_s1 + $0x18] sm:$0xff]  ;;  %1842 = vmatprep.subr.mxu1 %v2139_v0  ;;  %v2168_v2 = vld [vmem:[%s2633_s1 + $0x10] sm:$0xff]  ;;  %v2187_v5 = vld [vmem:[%s2633_s1 + $0x8] sm:$0xff] }
   0x2   :  { %v2173_v3 = vld [vmem:[%s2633_s1 + $0x38] sm:$0xff]  ;;  %1832 = vmatpush3.msra.mxu0 %v2162_v1  ;;  %v2180_v4 = vld [vmem:[%s2633_s1 + $0x30] sm:$0xff]  ;;  %v2194_v6 = vld [vmem:[%s2633_s1 + $0x28] sm:$0xff]  ;;  %1839 = vmatprep.mubr.msk.f32.mxu0 %vm2140_vm0, %v2139_v0 }
   0x3   :  { %1843 = vmatpush3.msra.mxu1 %v2173_v3  ;;  %1833 = vmatprep.subr.mxu0 %v2139_v0  ;;  %v2201_v7 = vld [vmem:[%s2633_s1] sm:$0xff]  ;;  %v1707_v11 = vld [vmem:[%s2634_s0 + $0x10] sm:$0x3]  ;;  %v1712_v49 = vld [vmem:[%s2634_s0 + $0x12] sm:$0x3] }
   0x4   :  { %1844 = vmatprep.subr.mxu1 %v2139_v0  ;;  %1834 = vmatpush3.msra.mxu0 %v2168_v2  ;;  %v2209_v8 = vld [vmem:[%s2633_s1 + $0x20] sm:$0xff] }
   0x5   :  { %1845 = vmatpush3.msra.mxu1 %v2180_v4  ;;  %1835 = vmatprep.subr.mxu0 %v2139_v0  ;;  %v20_v9 = vld [vmem:[%s2634_s0] sm:$0x3]  ;;  %v1709_v45 = vld [vmem:[%s2634_s0 + $0x2] sm:$0x3] }
   0x6   :  { %1846 = vmatprep.subr.mxu1 %v2139_v0  ;;  %1836 = vmatpush3.msra.mxu0 %v2187_v5 }
   0x7   :  { %1837 = vmatprep.subr.mxu0 %v2139_v0  ;;  %1847 = vmatpush3.msra.mxu1 %v2194_v6 }
   0x8   :  { %1838 = vmatpush3.msra.mxu0 %v2201_v7  ;;  %1848 = vmatprep.subr.mxu1 %v2139_v0 }
   0x9   :  { %1840 = vmatmul.mubr.f32.vlgmr.msra.gmra.mxu0 %v2139_v0  ;;  %1849 = vmatpush3.msra.mxu1 %v2209_v8 }
   0xa   :  { %1850 = vmatprep.mubr.msk.f32.mxu1 %vm2140_vm0, %v2139_v0  ;;  %1853 = vmatprep.subr.mxu0 %v2139_v0 }
   0xb   :  { %1851 = vmatmul.mubr.f32.vlgmr.msra.gmra.mxu1 %v2139_v0  ;;  %1854 = vmatpush3.msra.mxu0 %v2162_v1 }
   0xc   :  { %1855 = vmatprep.subr.mxu0 %v2139_v0  ;;  %1864 = vmatprep.subr.mxu1 %v2139_v0 }
   0xd   :  { %1856 = vmatpush3.msra.mxu0 %v2168_v2  ;;  %1865 = vmatpush3.msra.mxu1 %v2173_v3 }
   0xe   :  { %1857 = vmatprep.subr.mxu0 %v2139_v0  ;;  %1866 = vmatprep.subr.mxu1 %v2139_v0 }
   0xf   :  { %1858 = vmatpush3.msra.mxu0 %v2187_v5  ;;  %1861 = vmatprep.mubr.msk.f32.mxu0 %vm2140_vm0, %v2139_v0 }
  0x10   :  { %1859 = vmatprep.subr.mxu0 %v2139_v0  ;;  %1867 = vmatpush3.msra.mxu1 %v2180_v4 }
  0x11   :  { %1860 = vmatpush3.msra.mxu0 %v2201_v7  ;;  %1868 = vmatprep.subr.mxu1 %v2139_v0 }
  0x12   :  { %1869 = vmatpush3.msra.mxu1 %v2194_v6  ;;  %1872 = vmatprep.mubr.msk.f32.mxu1 %vm2140_vm0, %v2139_v0 }
  0x13   :  { %1870 = vmatprep.subr.mxu1 %v2139_v0  ;;  %1875 = vmatprep.subr.mxu0 %v2139_v0 }
  0x14   :  { %1871 = vmatpush3.msra.mxu1 %v2209_v8 }
  0x15   :  { %1886 = vmatprep.subr.mxu1 %v2139_v0 }
  0xc9   :  { %v91_v10 = vpop.f32.mrf.mxu0 }
  0xca   :  { %v95_v12 = vadd.f32 %v91_v10, %v20_v9 }
  0xcb   :  { %v1841_v13 = vpop.f32.mrf.mxu0  ;;  %v188_v14 = vpop.f32.mrf.mxu1 }
  0xcc   :  { %2011 = vtanh.f32 %v95_v12  ;;  %v192_v15 = vadd.f32 %v1707_v11, %v188_v14  ;;  %v1706_v19 = vmul.f32 -1.442695, %v95_v12 }
  0xcd   :  { %v1852_v16 = vpop.f32.mrf.mxu1 }
  0xce   :  { %2013 = vtanh.f32 %v192_v15  ;;  %v1708_v20 = vmul.f32 -1.442695, %v192_v15 }
  0xcf   :  { %2015 = vpow2.f32 %v1706_v19 }
  0xd0   :  { %2017 = vpow2.f32 %v1708_v20 }
  0xd9   :  { %v2012_v17 = vpop.eup %2011 }
  0xda   :  { %105 = vrot.lane.b32.xlu0 %v2012_v17, %s2141_s28 }
  0xdb   :  { %v2014_v18 = vpop.eup %2013 }
  0xdc   :  { %v2016_v21 = vpop.eup %2015 }
  0xdd   :  { %v99_v22 = vadd.f32 1.0, %v2016_v21  ;;  %v2018_v23 = vpop.eup %2017 }
  0xde   :  { %202 = vrot.lane.b32.xlu0 %v2014_v18, %s2141_s28  ;;  %v196_v24 = vadd.f32 1.0, %v2018_v23 }
  0xdf   :  { %2019 = vrcp.f32 %v99_v22 }
  0xe0   :  { %2021 = vrcp.f32 %v196_v24 }
  0xec   :  { %v2020_v25 = vpop.eup %2019 }
  0xed   :  { %v2022_v28 = vpop.eup %2021  ;;  %v103_v31 = vmul.f32 0.0, %v2020_v25 }
  0xee   :  { %v200_v34 = vmul.f32 0.0, %v2022_v28 }
 0x14c   :  { %v106_v26 = vpop.permute.xlu0 %105 }
 0x14d   :  { %v108_v27 = vmul.f32 %v2020_v25, %v106_v26  ;;  %v1715_v26 = vld [vmem:[%s2634_s0 + $0x4] sm:$0x3] }
 0x14f   :  { %110 = vrot.lane.b32.xlu1 %v108_v27, %s2142_s29 }
 0x150   :  { %v203_v29 = vpop.permute.xlu0 %202 }
 0x151   :  { %v205_v30 = vmul.f32 %v2022_v28, %v203_v29 }
 0x153   :  { %207 = vrot.lane.b32.xlu1 %v205_v30, %s2142_s29  ;;  %v1718_v30 = vld [vmem:[%s2634_s0 + $0x14] sm:$0x3] }
 0x1c1   :  { %v111_v32 = vpop.permute.xlu1 %110 }
 0x1c2   :  { %v2252_v33 = vadd.f32 %v111_v32, %v103_v31 }
 0x1c4   :  { %2023 = vtanh.f32 %v2252_v33 }
 0x1c5   :  { %v208_v35 = vpop.permute.xlu1 %207 }
 0x1c6   :  { %v2255_v36 = vadd.f32 %v208_v35, %v200_v34 }
 0x1c8   :  { %2025 = vtanh.f32 %v2255_v36 }
 0x1d1   :  { %v2024_v37 = vpop.eup %2023 }
 0x1d2   :  { %116 = vrot.lane.b32.xlu0 %v2024_v37, %s2141_s28 }
 0x1d5   :  { %v2026_v38 = vpop.eup %2025 }
 0x1d6   :  { %213 = vrot.lane.b32.xlu1 %v2026_v38, %s2141_s28 }
 0x244   :  { %v117_v39 = vpop.permute.xlu0 %116 }
 0x245   :  { %v119_v40 = vmul.f32 %v2020_v25, %v117_v39 }
 0x247   :  { %220 = vrot.lane.b32.xlu0 %v119_v40, %s2142_s29 }
 0x248   :  { %v214_v41 = vpop.permute.xlu1 %213 }
 0x249   :  { %v2261_v42 = vmul.f32 %v2022_v28, %v214_v41 }
 0x24b   :  { %322 = vrot.lane.b32.xlu1 %v2261_v42, %s2142_s29 }
 0x2b9   :  { %v2265_v43 = vpop.permute.xlu0 %220 }
 0x2ba   :  { %1862 = vmatmul.mubr.msk.f32.vlgmr.msra.gmra.mxu0 %vm21_vm1, %v2265_v43 }
 0x2bb   :  { %1876 = vmatpush3.msra.mxu0 %v2162_v1  ;;  %1883 = vmatprep.mubr.msk.f32.mxu0 %vm2140_vm0, %v2139_v0 }
 0x2bc   :  { %1877 = vmatprep.subr.mxu0 %v2139_v0 }
 0x2bd   :  { %v323_v44 = vpop.permute.xlu1 %322  ;;  %1878 = vmatpush3.msra.mxu0 %v2168_v2 }
 0x2be   :  { %1873 = vmatmul.mubr.msk.f32.vlgmr.msra.gmra.mxu1 %vm21_vm1, %v323_v44  ;;  %1879 = vmatprep.subr.mxu0 %v2139_v0 }
 0x2bf   :  { %1880 = vmatpush3.msra.mxu0 %v2187_v5  ;;  %1887 = vmatpush3.msra.mxu1 %v2173_v3 }
 0x2c0   :  { %1881 = vmatprep.subr.mxu0 %v2139_v0  ;;  %1888 = vmatprep.subr.mxu1 %v2139_v0 }
 0x2c1   :  { %1882 = vmatpush3.msra.mxu0 %v2201_v7  ;;  %1889 = vmatpush3.msra.mxu1 %v2180_v4 }
 0x2c2   :  { %1890 = vmatprep.subr.mxu1 %v2139_v0  ;;  %1894 = vmatprep.mubr.msk.f32.mxu1 %vm2140_vm0, %v2139_v0 }
 0x2c3   :  { %1891 = vmatpush3.msra.mxu1 %v2194_v6  ;;  %1897 = vmatprep.subr.mxu0 %v2139_v0 }
 0x2c4   :  { %1892 = vmatprep.subr.mxu1 %v2139_v0 }
 0x2c5   :  { %1893 = vmatpush3.msra.mxu1 %v2209_v8 }
 0x2c6   :  { %1908 = vmatprep.subr.mxu1 %v2139_v0 }
 0x37a   :  { %v290_v46 = vpop.f32.mrf.mxu0 }
 0x37b   :  { %v294_v47 = vadd.f32 %v1709_v45, %v290_v46 }
 0x37c   :  { %v1863_v48 = vpop.f32.mrf.mxu0 }
 0x37d   :  { %2027 = vtanh.f32 %v294_v47  ;;  %v1711_v55 = vmul.f32 -1.442695, %v294_v47 }
 0x37e   :  { %v392_v50 = vpop.f32.mrf.mxu1 }
 0x37f   :  { %v396_v51 = vadd.f32 %v1712_v49, %v392_v50 }
 0x380   :  { %v1874_v52 = vpop.f32.mrf.mxu1 }
 0x381   :  { %2029 = vtanh.f32 %v396_v51  ;;  %v1714_v56 = vmul.f32 -1.442695, %v396_v51 }
 0x382   :  { %2031 = vpow2.f32 %v1711_v55 }
 0x383   :  { %2033 = vpow2.f32 %v1714_v56 }
 0x38a   :  { %v2028_v53 = vpop.eup %2027 }
 0x38b   :  { %304 = vrot.lane.b32.xlu0 %v2028_v53, %s2141_s28 }
 0x38e   :  { %v2030_v54 = vpop.eup %2029 }
 0x38f   :  { %406 = vrot.lane.b32.xlu1 %v2030_v54, %s2141_s28  ;;  %v2032_v57 = vpop.eup %2031 }
 0x390   :  { %v298_v58 = vadd.f32 1.0, %v2032_v57  ;;  %v2034_v59 = vpop.eup %2033 }
 0x391   :  { %v400_v60 = vadd.f32 1.0, %v2034_v59 }
 0x392   :  { %2035 = vrcp.f32 %v298_v58 }
 0x393   :  { %2037 = vrcp.f32 %v400_v60 }
 0x39f   :  { %v2036_v61 = vpop.eup %2035 }
 0x3a0   :  { %v2038_v9 = vpop.eup %2037  ;;  %v302_v12 = vmul.f32 %v2036_v61, %v2252_v33 }
 0x3a1   :  { %v404_v15 = vmul.f32 %v2038_v9, %v2255_v36 }
 0x3fd   :  { %v305_v62 = vpop.permute.xlu0 %304 }
 0x3fe   :  { %v307_v63 = vmul.f32 %v2036_v61, %v305_v62 }
 0x400   :  { %309 = vrot.lane.b32.xlu0 %v307_v63, %s2142_s29 }
 0x401   :  { %v407_v10 = vpop.permute.xlu1 %406 }
 0x402   :  { %v409_v11 = vmul.f32 %v2038_v9, %v407_v10 }
 0x404   :  { %411 = vrot.lane.b32.xlu1 %v409_v11, %s2142_s29 }
 0x472   :  { %v310_v13 = vpop.permute.xlu0 %309 }
 0x473   :  { %v2301_v14 = vadd.f32 %v310_v13, %v302_v12  ;;  %v1724_v13 = vld [vmem:[%s2634_s0 + $0x16] sm:$0x3] }
 0x475   :  { %2039 = vtanh.f32 %v2301_v14 }
 0x476   :  { %v412_v16 = vpop.permute.xlu1 %411 }
 0x477   :  { %v2305_v17 = vadd.f32 %v412_v16, %v404_v15 }
 0x479   :  { %2041 = vtanh.f32 %v2305_v17 }
 0x482   :  { %v2040_v18 = vpop.eup %2039 }
 0x483   :  { %315 = vrot.lane.b32.xlu0 %v2040_v18, %s2141_s28 }
 0x486   :  { %v2042_v19 = vpop.eup %2041 }
 0x487   :  { %417 = vrot.lane.b32.xlu1 %v2042_v19, %s2141_s28 }
 0x4f5   :  { %v316_v20 = vpop.permute.xlu0 %315 }
 0x4f6   :  { %v318_v21 = vmul.f32 %v2036_v61, %v316_v20 }
 0x4f8   :  { %424 = vrot.lane.b32.xlu0 %v318_v21, %s2142_s29 }
 0x4f9   :  { %v418_v22 = vpop.permute.xlu1 %417 }
 0x4fa   :  { %v2311_v23 = vmul.f32 %v2038_v9, %v418_v22  ;;  %v1721_v9 = vld [vmem:[%s2634_s0 + $0x6] sm:$0x3] }
 0x4fc   :  { %526 = vrot.lane.b32.xlu1 %v2311_v23, %s2142_s29 }
 0x56a   :  { %v2315_v24 = vpop.permute.xlu0 %424 }
 0x56b   :  { %1884 = vmatmul.mubr.msk.f32.vlgmr.msra.gmra.mxu0 %vm21_vm1, %v2315_v24 }
 0x56c   :  { %1898 = vmatpush3.msra.mxu0 %v2162_v1  ;;  %1905 = vmatprep.mubr.msk.f32.mxu0 %vm2140_vm0, %v2139_v0 }
 0x56d   :  { %1899 = vmatprep.subr.mxu0 %v2139_v0 }
 0x56e   :  { %v527_v25 = vpop.permute.xlu1 %526  ;;  %1900 = vmatpush3.msra.mxu0 %v2168_v2 }
 0x56f   :  { %1895 = vmatmul.mubr.msk.f32.vlgmr.msra.gmra.mxu1 %vm21_vm1, %v527_v25  ;;  %1901 = vmatprep.subr.mxu0 %v2139_v0 }
 0x570   :  { %1902 = vmatpush3.msra.mxu0 %v2187_v5  ;;  %1909 = vmatpush3.msra.mxu1 %v2173_v3 }
 0x571   :  { %1903 = vmatprep.subr.mxu0 %v2139_v0  ;;  %1910 = vmatprep.subr.mxu1 %v2139_v0 }
 0x572   :  { %1904 = vmatpush3.msra.mxu0 %v2201_v7  ;;  %1911 = vmatpush3.msra.mxu1 %v2180_v4 }
 0x573   :  { %1912 = vmatprep.subr.mxu1 %v2139_v0  ;;  %1916 = vmatprep.mubr.msk.f32.mxu1 %vm2140_vm0, %v2139_v0 }
 0x574   :  { %1913 = vmatpush3.msra.mxu1 %v2194_v6  ;;  %1919 = vmatprep.subr.mxu0 %v2139_v0 }
 0x575   :  { %1914 = vmatprep.subr.mxu1 %v2139_v0 }
 0x576   :  { %1915 = vmatpush3.msra.mxu1 %v2209_v8 }
 0x577   :  { %1930 = vmatprep.subr.mxu1 %v2139_v0 }
 0x62b   :  { %v494_v27 = vpop.f32.mrf.mxu0 }
 0x62c   :  { %v498_v28 = vadd.f32 %v1715_v26, %v494_v27 }
 0x62d   :  { %v1885_v29 = vpop.f32.mrf.mxu0 }
 0x62e   :  { %2043 = vtanh.f32 %v498_v28  ;;  %v1717_v36 = vmul.f32 -1.442695, %v498_v28 }
 0x62f   :  { %v596_v31 = vpop.f32.mrf.mxu1 }
 0x630   :  { %v600_v32 = vadd.f32 %v1718_v30, %v596_v31 }
 0x631   :  { %v1896_v33 = vpop.f32.mrf.mxu1 }
 0x632   :  { %2045 = vtanh.f32 %v600_v32  ;;  %v1720_v37 = vmul.f32 -1.442695, %v600_v32 }
 0x633   :  { %2047 = vpow2.f32 %v1717_v36 }
 0x634   :  { %2049 = vpow2.f32 %v1720_v37 }
 0x63b   :  { %v2044_v34 = vpop.eup %2043 }
 0x63c   :  { %508 = vrot.lane.b32.xlu0 %v2044_v34, %s2141_s28 }
 0x63f   :  { %v2046_v35 = vpop.eup %2045 }
 0x640   :  { %610 = vrot.lane.b32.xlu1 %v2046_v35, %s2141_s28  ;;  %v2048_v38 = vpop.eup %2047 }
 0x641   :  { %v502_v39 = vadd.f32 1.0, %v2048_v38  ;;  %v2050_v40 = vpop.eup %2049 }
 0x642   :  { %v604_v41 = vadd.f32 1.0, %v2050_v40 }
 0x643   :  { %2051 = vrcp.f32 %v502_v39 }
 0x644   :  { %2053 = vrcp.f32 %v604_v41 }
 0x650   :  { %v2052_v44 = vpop.eup %2051 }
 0x651   :  { %v2054_v47 = vpop.eup %2053  ;;  %v506_v50 = vmul.f32 %v2052_v44, %v2301_v14 }
 0x652   :  { %v608_v53 = vmul.f32 %v2054_v47, %v2305_v17 }
 0x6ae   :  { %v509_v45 = vpop.permute.xlu0 %508 }
 0x6af   :  { %v511_v46 = vmul.f32 %v2052_v44, %v509_v45 }
 0x6b1   :  { %513 = vrot.lane.b32.xlu0 %v511_v46, %s2142_s29 }
 0x6b2   :  { %v611_v48 = vpop.permute.xlu1 %610 }
 0x6b3   :  { %v613_v49 = vmul.f32 %v2054_v47, %v611_v48 }
 0x6b5   :  { %615 = vrot.lane.b32.xlu1 %v613_v49, %s2142_s29  ;;  %v1727_v49 = vld [vmem:[%s2634_s0 + $0x8] sm:$0x3] }
 0x723   :  { %v514_v51 = vpop.permute.xlu0 %513 }
 0x724   :  { %v2351_v52 = vadd.f32 %v514_v51, %v506_v50 }
 0x726   :  { %2055 = vtanh.f32 %v2351_v52 }
 0x727   :  { %v616_v54 = vpop.permute.xlu1 %615 }
 0x728   :  { %v2355_v55 = vadd.f32 %v616_v54, %v608_v53  ;;  %v1730_v53 = vld [vmem:[%s2634_s0 + $0x18] sm:$0x3] }
 0x72a   :  { %2057 = vtanh.f32 %v2355_v55 }
 0x733   :  { %v2056_v56 = vpop.eup %2055 }
 0x734   :  { %519 = vrot.lane.b32.xlu0 %v2056_v56, %s2141_s28 }
 0x737   :  { %v2058_v57 = vpop.eup %2057 }
 0x738   :  { %621 = vrot.lane.b32.xlu1 %v2058_v57, %s2141_s28 }
 0x7a6   :  { %v520_v58 = vpop.permute.xlu0 %519 }
 0x7a7   :  { %v522_v59 = vmul.f32 %v2052_v44, %v520_v58 }
 0x7a9   :  { %628 = vrot.lane.b32.xlu0 %v522_v59, %s2142_s29 }
 0x7aa   :  { %v622_v60 = vpop.permute.xlu1 %621 }
 0x7ab   :  { %v2361_v61 = vmul.f32 %v2054_v47, %v622_v60 }
 0x7ad   :  { %730 = vrot.lane.b32.xlu1 %v2361_v61, %s2142_s29 }
 0x81b   :  { %v2365_v62 = vpop.permute.xlu0 %628 }
 0x81c   :  { %1906 = vmatmul.mubr.msk.f32.vlgmr.msra.gmra.mxu0 %vm21_vm1, %v2365_v62 }
 0x81d   :  { %1920 = vmatpush3.msra.mxu0 %v2162_v1  ;;  %1927 = vmatprep.mubr.msk.f32.mxu0 %vm2140_vm0, %v2139_v0 }
 0x81e   :  { %1921 = vmatprep.subr.mxu0 %v2139_v0 }
 0x81f   :  { %v731_v63 = vpop.permute.xlu1 %730  ;;  %1922 = vmatpush3.msra.mxu0 %v2168_v2 }
 0x820   :  { %1917 = vmatmul.mubr.msk.f32.vlgmr.msra.gmra.mxu1 %vm21_vm1, %v731_v63  ;;  %1923 = vmatprep.subr.mxu0 %v2139_v0 }
 0x821   :  { %1924 = vmatpush3.msra.mxu0 %v2187_v5  ;;  %1931 = vmatpush3.msra.mxu1 %v2173_v3 }
 0x822   :  { %1925 = vmatprep.subr.mxu0 %v2139_v0  ;;  %1932 = vmatprep.subr.mxu1 %v2139_v0 }
 0x823   :  { %1926 = vmatpush3.msra.mxu0 %v2201_v7  ;;  %1933 = vmatpush3.msra.mxu1 %v2180_v4 }
 0x824   :  { %1934 = vmatprep.subr.mxu1 %v2139_v0  ;;  %1938 = vmatprep.mubr.msk.f32.mxu1 %vm2140_vm0, %v2139_v0 }
 0x825   :  { %1935 = vmatpush3.msra.mxu1 %v2194_v6  ;;  %1941 = vmatprep.subr.mxu0 %v2139_v0 }
 0x826   :  { %1936 = vmatprep.subr.mxu1 %v2139_v0 }
 0x827   :  { %1937 = vmatpush3.msra.mxu1 %v2209_v8 }
 0x828   :  { %1952 = vmatprep.subr.mxu1 %v2139_v0 }
 0x8dc   :  { %v698_v10 = vpop.f32.mrf.mxu0 }
 0x8dd   :  { %v702_v11 = vadd.f32 %v1721_v9, %v698_v10 }
 0x8de   :  { %v1907_v12 = vpop.f32.mrf.mxu0 }
 0x8df   :  { %2059 = vtanh.f32 %v702_v11  ;;  %v1723_v19 = vmul.f32 -1.442695, %v702_v11 }
 0x8e0   :  { %v800_v14 = vpop.f32.mrf.mxu1 }
 0x8e1   :  { %v804_v15 = vadd.f32 %v1724_v13, %v800_v14 }
 0x8e2   :  { %v1918_v16 = vpop.f32.mrf.mxu1 }
 0x8e3   :  { %2061 = vtanh.f32 %v804_v15  ;;  %v1726_v20 = vmul.f32 -1.442695, %v804_v15 }
 0x8e4   :  { %2063 = vpow2.f32 %v1723_v19 }
 0x8e5   :  { %2065 = vpow2.f32 %v1726_v20 }
 0x8ec   :  { %v2060_v17 = vpop.eup %2059 }
 0x8ed   :  { %712 = vrot.lane.b32.xlu0 %v2060_v17, %s2141_s28 }
 0x8f0   :  { %v2062_v18 = vpop.eup %2061 }
 0x8f1   :  { %814 = vrot.lane.b32.xlu1 %v2062_v18, %s2141_s28  ;;  %v2064_v21 = vpop.eup %2063 }
 0x8f2   :  { %v706_v22 = vadd.f32 1.0, %v2064_v21  ;;  %v2066_v25 = vpop.eup %2065 }
 0x8f3   :  { %v808_v26 = vadd.f32 1.0, %v2066_v25 }
 0x8f4   :  { %2067 = vrcp.f32 %v706_v22 }
 0x8f5   :  { %2069 = vrcp.f32 %v808_v26 }
 0x901   :  { %v2068_v27 = vpop.eup %2067 }
 0x902   :  { %v2070_v30 = vpop.eup %2069  ;;  %v710_v33 = vmul.f32 %v2068_v27, %v2351_v52 }
 0x903   :  { %v812_v36 = vmul.f32 %v2070_v30, %v2355_v55 }
 0x95f   :  { %v713_v28 = vpop.permute.xlu0 %712 }
 0x960   :  { %v715_v29 = vmul.f32 %v2068_v27, %v713_v28 }
 0x962   :  { %717 = vrot.lane.b32.xlu0 %v715_v29, %s2142_s29 }
 0x963   :  { %v815_v31 = vpop.permute.xlu1 %814 }
 0x964   :  { %v817_v32 = vmul.f32 %v2070_v30, %v815_v31 }
 0x966   :  { %819 = vrot.lane.b32.xlu1 %v817_v32, %s2142_s29 }
 0x9d4   :  { %v718_v34 = vpop.permute.xlu0 %717 }
 0x9d5   :  { %v2401_v35 = vadd.f32 %v718_v34, %v710_v33  ;;  %v1733_v34 = vld [vmem:[%s2634_s0 + $0xa] sm:$0x3] }
 0x9d7   :  { %2071 = vtanh.f32 %v2401_v35 }
 0x9d8   :  { %v820_v37 = vpop.permute.xlu1 %819 }
 0x9d9   :  { %v2405_v38 = vadd.f32 %v820_v37, %v812_v36 }
 0x9db   :  { %2073 = vtanh.f32 %v2405_v38 }
 0x9e4   :  { %v2072_v39 = vpop.eup %2071 }
 0x9e5   :  { %723 = vrot.lane.b32.xlu0 %v2072_v39, %s2141_s28 }
 0x9e8   :  { %v2074_v40 = vpop.eup %2073 }
 0x9e9   :  { %825 = vrot.lane.b32.xlu1 %v2074_v40, %s2141_s28 }
 0xa57   :  { %v724_v41 = vpop.permute.xlu0 %723 }
 0xa58   :  { %v726_v44 = vmul.f32 %v2068_v27, %v724_v41 }
 0xa5a   :  { %832 = vrot.lane.b32.xlu0 %v726_v44, %s2142_s29 }
 0xa5b   :  { %v826_v45 = vpop.permute.xlu1 %825 }
 0xa5c   :  { %v2411_v46 = vmul.f32 %v2070_v30, %v826_v45 }
 0xa5e   :  { %934 = vrot.lane.b32.xlu1 %v2411_v46, %s2142_s29 }
 0xacc   :  { %v2415_v47 = vpop.permute.xlu0 %832 }
 0xacd   :  { %1928 = vmatmul.mubr.msk.f32.vlgmr.msra.gmra.mxu0 %vm21_vm1, %v2415_v47 }
 0xace   :  { %1942 = vmatpush3.msra.mxu0 %v2162_v1  ;;  %1949 = vmatprep.mubr.msk.f32.mxu0 %vm2140_vm0, %v2139_v0 }
 0xacf   :  { %1943 = vmatprep.subr.mxu0 %v2139_v0 }
 0xad0   :  { %v935_v48 = vpop.permute.xlu1 %934  ;;  %1944 = vmatpush3.msra.mxu0 %v2168_v2 }
 0xad1   :  { %1939 = vmatmul.mubr.msk.f32.vlgmr.msra.gmra.mxu1 %vm21_vm1, %v935_v48  ;;  %1945 = vmatprep.subr.mxu0 %v2139_v0 }
 0xad2   :  { %1946 = vmatpush3.msra.mxu0 %v2187_v5  ;;  %1953 = vmatpush3.msra.mxu1 %v2173_v3 }
 0xad3   :  { %1947 = vmatprep.subr.mxu0 %v2139_v0  ;;  %1954 = vmatprep.subr.mxu1 %v2139_v0 }
 0xad4   :  { %1948 = vmatpush3.msra.mxu0 %v2201_v7  ;;  %1955 = vmatpush3.msra.mxu1 %v2180_v4 }
 0xad5   :  { %1956 = vmatprep.subr.mxu1 %v2139_v0  ;;  %1960 = vmatprep.mubr.msk.f32.mxu1 %vm2140_vm0, %v2139_v0 }
 0xad6   :  { %1957 = vmatpush3.msra.mxu1 %v2194_v6  ;;  %1963 = vmatprep.subr.mxu0 %v2139_v0 }
 0xad7   :  { %1958 = vmatprep.subr.mxu1 %v2139_v0 }
 0xad8   :  { %1959 = vmatpush3.msra.mxu1 %v2209_v8 }
 0xad9   :  { %1974 = vmatprep.subr.mxu1 %v2139_v0 }
 0xb8d   :  { %v902_v50 = vpop.f32.mrf.mxu0 }
 0xb8e   :  { %v906_v51 = vadd.f32 %v1727_v49, %v902_v50 }
 0xb8f   :  { %v1929_v52 = vpop.f32.mrf.mxu0 }
 0xb90   :  { %2075 = vtanh.f32 %v906_v51  ;;  %v1729_v59 = vmul.f32 -1.442695, %v906_v51 }
 0xb91   :  { %v1004_v54 = vpop.f32.mrf.mxu1 }
 0xb92   :  { %v1008_v55 = vadd.f32 %v1730_v53, %v1004_v54 }
 0xb93   :  { %v1940_v56 = vpop.f32.mrf.mxu1 }
 0xb94   :  { %2077 = vtanh.f32 %v1008_v55  ;;  %v1732_v60 = vmul.f32 -1.442695, %v1008_v55 }
 0xb95   :  { %2079 = vpow2.f32 %v1729_v59 }
 0xb96   :  { %2081 = vpow2.f32 %v1732_v60 }
 0xb9d   :  { %v2076_v57 = vpop.eup %2075 }
 0xb9e   :  { %916 = vrot.lane.b32.xlu0 %v2076_v57, %s2141_s28 }
 0xba1   :  { %v2078_v58 = vpop.eup %2077 }
 0xba2   :  { %1018 = vrot.lane.b32.xlu1 %v2078_v58, %s2141_s28  ;;  %v2080_v63 = vpop.eup %2079 }
 0xba3   :  { %v910_v9 = vadd.f32 1.0, %v2080_v63  ;;  %v2082_v10 = vpop.eup %2081 }
 0xba4   :  { %v1012_v11 = vadd.f32 1.0, %v2082_v10 }
 0xba5   :  { %2083 = vrcp.f32 %v910_v9 }
 0xba6   :  { %2085 = vrcp.f32 %v1012_v11 }
 0xbb2   :  { %v2084_v12 = vpop.eup %2083 }
 0xbb3   :  { %v2086_v15 = vpop.eup %2085  ;;  %v914_v18 = vmul.f32 %v2084_v12, %v2401_v35 }
 0xbb4   :  { %v1016_v21 = vmul.f32 %v2086_v15, %v2405_v38  ;;  %v1736_v38 = vld [vmem:[%s2634_s0 + $0x1a] sm:$0x3] }
 0xc10   :  { %v917_v13 = vpop.permute.xlu0 %916 }
 0xc11   :  { %v919_v14 = vmul.f32 %v2084_v12, %v917_v13 }
 0xc13   :  { %921 = vrot.lane.b32.xlu0 %v919_v14, %s2142_s29 }
 0xc14   :  { %v1019_v16 = vpop.permute.xlu1 %1018 }
 0xc15   :  { %v1021_v17 = vmul.f32 %v2086_v15, %v1019_v16 }
 0xc17   :  { %1023 = vrot.lane.b32.xlu1 %v1021_v17, %s2142_s29 }
 0xc85   :  { %v922_v19 = vpop.permute.xlu0 %921 }
 0xc86   :  { %v2451_v20 = vadd.f32 %v922_v19, %v914_v18 }
 0xc88   :  { %2087 = vtanh.f32 %v2451_v20 }
 0xc89   :  { %v1024_v22 = vpop.permute.xlu1 %1023 }
 0xc8a   :  { %v2455_v25 = vadd.f32 %v1024_v22, %v1016_v21 }
 0xc8c   :  { %2089 = vtanh.f32 %v2455_v25 }
 0xc95   :  { %v2088_v26 = vpop.eup %2087 }
 0xc96   :  { %927 = vrot.lane.b32.xlu0 %v2088_v26, %s2141_s28 }
 0xc99   :  { %v2090_v27 = vpop.eup %2089 }
 0xc9a   :  { %1029 = vrot.lane.b32.xlu1 %v2090_v27, %s2141_s28 }
 0xd08   :  { %v928_v28 = vpop.permute.xlu0 %927 }
 0xd09   :  { %v930_v29 = vmul.f32 %v2084_v12, %v928_v28 }
 0xd0b   :  { %1036 = vrot.lane.b32.xlu0 %v930_v29, %s2142_s29 }
 0xd0c   :  { %v1030_v30 = vpop.permute.xlu1 %1029 }
 0xd0d   :  { %v2461_v31 = vmul.f32 %v2086_v15, %v1030_v30 }
 0xd0f   :  { %1138 = vrot.lane.b32.xlu1 %v2461_v31, %s2142_s29 }
 0xd7d   :  { %v2465_v32 = vpop.permute.xlu0 %1036 }
 0xd7e   :  { %1950 = vmatmul.mubr.msk.f32.vlgmr.msra.gmra.mxu0 %vm21_vm1, %v2465_v32 }
 0xd7f   :  { %1964 = vmatpush3.msra.mxu0 %v2162_v1  ;;  %1971 = vmatprep.mubr.msk.f32.mxu0 %vm2140_vm0, %v2139_v0 }
 0xd80   :  { %1965 = vmatprep.subr.mxu0 %v2139_v0 }
 0xd81   :  { %v1139_v33 = vpop.permute.xlu1 %1138  ;;  %1966 = vmatpush3.msra.mxu0 %v2168_v2 }
 0xd82   :  { %1961 = vmatmul.mubr.msk.f32.vlgmr.msra.gmra.mxu1 %vm21_vm1, %v1139_v33  ;;  %1967 = vmatprep.subr.mxu0 %v2139_v0 }
 0xd83   :  { %1968 = vmatpush3.msra.mxu0 %v2187_v5  ;;  %1975 = vmatpush3.msra.mxu1 %v2173_v3 }
 0xd84   :  { %1969 = vmatprep.subr.mxu0 %v2139_v0  ;;  %1976 = vmatprep.subr.mxu1 %v2139_v0 }
 0xd85   :  { %1970 = vmatpush3.msra.mxu0 %v2201_v7  ;;  %1977 = vmatpush3.msra.mxu1 %v2180_v4 }
 0xd86   :  { %1978 = vmatprep.subr.mxu1 %v2139_v0  ;;  %1982 = vmatprep.mubr.msk.f32.mxu1 %vm2140_vm0, %v2139_v0 }
 0xd87   :  { %1979 = vmatpush3.msra.mxu1 %v2194_v6  ;;  %1985 = vmatprep.subr.mxu0 %v2139_v0 }
 0xd88   :  { %1980 = vmatprep.subr.mxu1 %v2139_v0 }
 0xd89   :  { %1981 = vmatpush3.msra.mxu1 %v2209_v8 }
 0xd8a   :  { %1996 = vmatprep.subr.mxu1 %v2139_v0 }
 0xe3e   :  { %v1106_v35 = vpop.f32.mrf.mxu0 }
 0xe3f   :  { %v1110_v36 = vadd.f32 %v1733_v34, %v1106_v35 }
 0xe40   :  { %v1951_v37 = vpop.f32.mrf.mxu0 }
 0xe41   :  { %2091 = vtanh.f32 %v1110_v36  ;;  %v1735_v48 = vmul.f32 -1.442695, %v1110_v36 }
 0xe42   :  { %v1208_v39 = vpop.f32.mrf.mxu1 }
 0xe43   :  { %v1212_v40 = vadd.f32 %v1736_v38, %v1208_v39 }
 0xe44   :  { %v1962_v41 = vpop.f32.mrf.mxu1 }
 0xe45   :  { %2093 = vtanh.f32 %v1212_v40  ;;  %v1738_v49 = vmul.f32 -1.442695, %v1212_v40 }
 0xe46   :  { %2095 = vpow2.f32 %v1735_v48 }
 0xe47   :  { %2097 = vpow2.f32 %v1738_v49 }
 0xe4e   :  { %v2092_v44 = vpop.eup %2091 }
 0xe4f   :  { %1120 = vrot.lane.b32.xlu0 %v2092_v44, %s2141_s28 }
 0xe52   :  { %v2094_v45 = vpop.eup %2093 }
 0xe53   :  { %1222 = vrot.lane.b32.xlu1 %v2094_v45, %s2141_s28  ;;  %v2096_v50 = vpop.eup %2095 }
 0xe54   :  { %v1114_v51 = vadd.f32 1.0, %v2096_v50  ;;  %v2098_v52 = vpop.eup %2097 }
 0xe55   :  { %v1216_v53 = vadd.f32 1.0, %v2098_v52 }
 0xe56   :  { %2099 = vrcp.f32 %v1114_v51 }
 0xe57   :  { %2101 = vrcp.f32 %v1216_v53 }
 0xe63   :  { %v2100_v54 = vpop.eup %2099 }
 0xe64   :  { %v2102_v57 = vpop.eup %2101  ;;  %v1118_v60 = vmul.f32 %v2100_v54, %v2451_v20 }
 0xe65   :  { %v1220_v10 = vmul.f32 %v2102_v57, %v2455_v25 }
 0xec1   :  { %v1121_v55 = vpop.permute.xlu0 %1120 }
 0xec2   :  { %v1123_v56 = vmul.f32 %v2100_v54, %v1121_v55 }
 0xec4   :  { %1125 = vrot.lane.b32.xlu0 %v1123_v56, %s2142_s29  ;;  %v1745_v56 = vld [vmem:[%s2634_s0 + $0xe] sm:$0x3] }
 0xec5   :  { %v1223_v58 = vpop.permute.xlu1 %1222 }
 0xec6   :  { %v1225_v59 = vmul.f32 %v2102_v57, %v1223_v58 }
 0xec8   :  { %1227 = vrot.lane.b32.xlu1 %v1225_v59, %s2142_s29 }
 0xf36   :  { %v1126_v63 = vpop.permute.xlu0 %1125 }
 0xf37   :  { %v2501_v9 = vadd.f32 %v1126_v63, %v1118_v60  ;;  %v1748_v60 = vld [vmem:[%s2634_s0 + $0x1e] sm:$0x3] }
 0xf39   :  { %2103 = vtanh.f32 %v2501_v9 }
 0xf3a   :  { %v1228_v11 = vpop.permute.xlu1 %1227 }
 0xf3b   :  { %v2505_v12 = vadd.f32 %v1228_v11, %v1220_v10 }
 0xf3d   :  { %2105 = vtanh.f32 %v2505_v12 }
 0xf46   :  { %v2104_v13 = vpop.eup %2103 }
 0xf47   :  { %1131 = vrot.lane.b32.xlu0 %v2104_v13, %s2141_s28 }
 0xf4a   :  { %v2106_v14 = vpop.eup %2105 }
 0xf4b   :  { %1233 = vrot.lane.b32.xlu1 %v2106_v14, %s2141_s28 }
 0xfb9   :  { %v1132_v15 = vpop.permute.xlu0 %1131 }
 0xfba   :  { %v1134_v16 = vmul.f32 %v2100_v54, %v1132_v15 }
 0xfbc   :  { %1240 = vrot.lane.b32.xlu0 %v1134_v16, %s2142_s29 }
 0xfbd   :  { %v1234_v17 = vpop.permute.xlu1 %1233 }
 0xfbe   :  { %v2511_v18 = vmul.f32 %v2102_v57, %v1234_v17 }
 0xfc0   :  { %1342 = vrot.lane.b32.xlu1 %v2511_v18, %s2142_s29 }
0x102e   :  { %v2515_v19 = vpop.permute.xlu0 %1240 }
0x102f   :  { %1972 = vmatmul.mubr.msk.f32.vlgmr.msra.gmra.mxu0 %vm21_vm1, %v2515_v19 }
0x1030   :  { %1986 = vmatpush3.msra.mxu0 %v2162_v1  ;;  %1993 = vmatprep.mubr.msk.f32.mxu0 %vm2140_vm0, %v2139_v0  ;;  %v1739_v1 = vld [vmem:[%s2634_s0 + $0xc] sm:$0x3] }
0x1031   :  { %1987 = vmatprep.subr.mxu0 %v2139_v0 }
0x1032   :  { %v1343_v20 = vpop.permute.xlu1 %1342  ;;  %1988 = vmatpush3.msra.mxu0 %v2168_v2 }
0x1033   :  { %1983 = vmatmul.mubr.msk.f32.vlgmr.msra.gmra.mxu1 %vm21_vm1, %v1343_v20  ;;  %1989 = vmatprep.subr.mxu0 %v2139_v0 }
0x1034   :  { %1990 = vmatpush3.msra.mxu0 %v2187_v5  ;;  %1997 = vmatpush3.msra.mxu1 %v2173_v3 }
0x1035   :  { %1991 = vmatprep.subr.mxu0 %v2139_v0  ;;  %1998 = vmatprep.subr.mxu1 %v2139_v0 }
0x1036   :  { %1992 = vmatpush3.msra.mxu0 %v2201_v7  ;;  %1999 = vmatpush3.msra.mxu1 %v2180_v4  ;;  %v1742_v4 = vld [vmem:[%s2634_s0 + $0x1c] sm:$0x3] }
0x1037   :  { %2000 = vmatprep.subr.mxu1 %v2139_v0  ;;  %2004 = vmatprep.mubr.msk.f32.mxu1 %vm2140_vm0, %v2139_v0 }
0x1038   :  { %2001 = vmatpush3.msra.mxu1 %v2194_v6 }
0x1039   :  { %2002 = vmatprep.subr.mxu1 %v2139_v0 }
0x103a   :  { %2003 = vmatpush3.msra.mxu1 %v2209_v8 }
0x10ef   :  { %v1310_v2 = vpop.f32.mrf.mxu0 }
0x10f0   :  { %v1314_v3 = vadd.f32 %v1739_v1, %v1310_v2 }
0x10f1   :  { %v1973_v5 = vpop.f32.mrf.mxu0 }
0x10f2   :  { %2107 = vtanh.f32 %v1314_v3  ;;  %v1741_v8 = vmul.f32 -1.442695, %v1314_v3 }
0x10f3   :  { %v1412_v7 = vpop.f32.mrf.mxu1 }
0x10f4   :  { %v1416_v21 = vadd.f32 %v1742_v4, %v1412_v7 }
0x10f5   :  { %v1984_v22 = vpop.f32.mrf.mxu1 }
0x10f6   :  { %2109 = vtanh.f32 %v1416_v21  ;;  %v1744_v25 = vmul.f32 -1.442695, %v1416_v21 }
0x10f7   :  { %2111 = vpow2.f32 %v1741_v8 }
0x10f8   :  { %2113 = vpow2.f32 %v1744_v25 }
0x10ff   :  { %v2108_v6 = vpop.eup %2107 }
0x1100   :  { %1324 = vrot.lane.b32.xlu0 %v2108_v6, %s2141_s28 }
0x1103   :  { %v2110_v0 = vpop.eup %2109 }
0x1104   :  { %1426 = vrot.lane.b32.xlu1 %v2110_v0, %s2141_s28  ;;  %v2112_v26 = vpop.eup %2111 }
0x1105   :  { %v1318_v27 = vadd.f32 1.0, %v2112_v26  ;;  %v2114_v28 = vpop.eup %2113 }
0x1106   :  { %v1420_v29 = vadd.f32 1.0, %v2114_v28 }
0x1107   :  { %2115 = vrcp.f32 %v1318_v27 }
0x1108   :  { %2117 = vrcp.f32 %v1420_v29 }
0x1114   :  { %v2116_v30 = vpop.eup %2115 }
0x1115   :  { %v2118_v35 = vpop.eup %2117  ;;  %v1322_v38 = vmul.f32 %v2116_v30, %v2501_v9 }
0x1116   :  { %v1424_v41 = vmul.f32 %v2118_v35, %v2505_v12 }
0x1172   :  { %v1325_v33 = vpop.permute.xlu0 %1324 }
0x1173   :  { %v1327_v34 = vmul.f32 %v2116_v30, %v1325_v33 }
0x1175   :  { %1329 = vrot.lane.b32.xlu0 %v1327_v34, %s2142_s29 }
0x1176   :  { %v1427_v36 = vpop.permute.xlu1 %1426 }
0x1177   :  { %v1429_v37 = vmul.f32 %v2118_v35, %v1427_v36 }
0x1179   :  { %1431 = vrot.lane.b32.xlu1 %v1429_v37, %s2142_s29 }
0x11e7   :  { %v1330_v39 = vpop.permute.xlu0 %1329 }
0x11e8   :  { %v1332_v40 = vadd.f32 %v1330_v39, %v1322_v38 }
0x11ea   :  { %2119 = vtanh.f32 %v1332_v40 }
0x11eb   :  { %v1432_v44 = vpop.permute.xlu1 %1431 }
0x11ec   :  { %v1434_v45 = vadd.f32 %v1432_v44, %v1424_v41 }
0x11ee   :  { %2121 = vtanh.f32 %v1434_v45 }
0x11f7   :  { %v2120_v48 = vpop.eup %2119 }
0x11f8   :  { %1335 = vrot.lane.b32.xlu0 %v2120_v48, %s2141_s28 }
0x11fb   :  { %v2122_v49 = vpop.eup %2121 }
0x11fc   :  { %1437 = vrot.lane.b32.xlu1 %v2122_v49, %s2141_s28 }
0x126a   :  { %v1336_v50 = vpop.permute.xlu0 %1335 }
0x126b   :  { %v1338_v51 = vmul.f32 %v2116_v30, %v1336_v50 }
0x126d   :  { %1444 = vrot.lane.b32.xlu0 %v1338_v51, %s2142_s29 }
0x126e   :  { %v1438_v52 = vpop.permute.xlu1 %1437 }
0x126f   :  { %v1440_v53 = vmul.f32 %v2118_v35, %v1438_v52 }
0x1271   :  { %1546 = vrot.lane.b32.xlu1 %v1440_v53, %s2142_s29 }
0x12df   :  { %v2554_v54 = vpop.permute.xlu0 %1444 }
0x12e0   :  { %1994 = vmatmul.mubr.msk.f32.vlgmr.msra.gmra.mxu0 %vm21_vm1, %v2554_v54 }
0x12e3   :  { %v1547_v55 = vpop.permute.xlu1 %1546 }
0x12e4   :  { %2005 = vmatmul.mubr.msk.f32.vlgmr.msra.gmra.mxu1 %vm21_vm1, %v1547_v55 }
0x13a0   :  { %v1514_v57 = vpop.f32.mrf.mxu0 }
0x13a1   :  { %v1518_v58 = vadd.f32 %v1745_v56, %v1514_v57 }
0x13a2   :  { %v1995_v59 = vpop.f32.mrf.mxu0 }
0x13a3   :  { %2123 = vtanh.f32 %v1518_v58  ;;  %v1747_v13 = vmul.f32 -1.442695, %v1518_v58 }
0x13a4   :  { %v1616_v63 = vpop.f32.mrf.mxu1 }
0x13a5   :  { %v1620_v9 = vadd.f32 %v1748_v60, %v1616_v63 }
0x13a6   :  { %v2006_v10 = vpop.f32.mrf.mxu1 }
0x13a7   :  { %2125 = vtanh.f32 %v1620_v9  ;;  %v1750_v14 = vmul.f32 -1.442695, %v1620_v9 }
0x13a8   :  { %2127 = vpow2.f32 %v1747_v13 }
0x13a9   :  { %2129 = vpow2.f32 %v1750_v14 }
0x13b0   :  { %v2124_v11 = vpop.eup %2123 }
0x13b1   :  { %1528 = vrot.lane.b32.xlu0 %v2124_v11, %s2141_s28 }
0x13b4   :  { %v2126_v12 = vpop.eup %2125 }
0x13b5   :  { %1630 = vrot.lane.b32.xlu1 %v2126_v12, %s2141_s28  ;;  %v2128_v15 = vpop.eup %2127 }
0x13b6   :  { %v1522_v16 = vadd.f32 1.0, %v2128_v15  ;;  %v2130_v17 = vpop.eup %2129 }
0x13b7   :  { %v1624_v20 = vadd.f32 1.0, %v2130_v17 }
0x13b8   :  { %2131 = vrcp.f32 %v1522_v16 }
0x13b9   :  { %2133 = vrcp.f32 %v1624_v20 }
0x13c5   :  { %v2132_v1 = vpop.eup %2131 }
0x13c6   :  { %v2134_v5 = vpop.eup %2133  ;;  %v1526_v21 = vmul.f32 %v2132_v1, %v1332_v40 }
0x13c7   :  { %v1628_v0 = vmul.f32 %v2134_v5, %v1434_v45 }
0x1423   :  { %v1529_v2 = vpop.permute.xlu0 %1528 }
0x1424   :  { %v1531_v3 = vmul.f32 %v2132_v1, %v1529_v2 }
0x1426   :  { %1533 = vrot.lane.b32.xlu0 %v1531_v3, %s2142_s29 }
0x1427   :  { %v1631_v4 = vpop.permute.xlu1 %1630 }
0x1428   :  { %v1633_v7 = vmul.f32 %v2134_v5, %v1631_v4 }
0x142a   :  { %1635 = vrot.lane.b32.xlu1 %v1633_v7, %s2142_s29 }
0x1498   :  { %v1534_v22 = vpop.permute.xlu0 %1533 }
0x1499   :  { %v1536_v6 = vadd.f32 %v1534_v22, %v1526_v21 }
0x149b   :  { %2135 = vtanh.f32 %v1536_v6 }
0x149c   :  { %v1636_v8 = vpop.permute.xlu1 %1635 }
0x149d   :  { %v1638_v25 = vadd.f32 %v1636_v8, %v1628_v0 }
0x149f   :  { %2137 = vtanh.f32 %v1638_v25 }
0x14a8   :  { %v2136_v26 = vpop.eup %2135 }
0x14a9   :  { %1539 = vrot.lane.b32.xlu0 %v2136_v26, %s2141_s28 }
0x14ac   :  { %v2138_v27 = vpop.eup %2137 }
0x14ad   :  { %1641 = vrot.lane.b32.xlu1 %v2138_v27, %s2141_s28  ;;  %1659 = vrot.lane.b32.xlu0 %v1440_v53, %s2141_s28 }
0x14b1   :  { %1661 = vrot.lane.b32.xlu1 %v2511_v18, %s2141_s28  ;;  %1663 = vrot.lane.b32.xlu0 %v2461_v31, %s2141_s28 }
0x14b5   :  { %1665 = vrot.lane.b32.xlu1 %v2411_v46, %s2141_s28  ;;  %1667 = vrot.lane.b32.xlu0 %v2361_v61, %s2141_s28 }
0x151b   :  { %v1540_v28 = vpop.permute.xlu0 %1539 }
0x151c   :  { %v1542_v29 = vmul.f32 %v2132_v1, %v1540_v28 }
0x151e   :  { %1646 = vrot.lane.b32.xlu0 %v1542_v29, %s2142_s29 }
0x151f   :  { %v1642_v30 = vpop.permute.xlu1 %1641  ;;  %v1660_v33 = vpop.permute.xlu0 %1659 }
0x1520   :  { %v1644_v34 = vmul.f32 %v2134_v5, %v1642_v30  ;;  %v1682_v18 = vsel %vm21_vm1, %v2315_v24, %v1660_v33 }
0x1521   :  { %1691 = vst.msk [vmem:[%s2635_s2 + $0x2] sm:$0x3] %vm1689_vm2, %v1682_v18 }
0x1522   :  { %1657 = vrot.lane.b32.xlu1 %v1644_v34, %s2141_s28  ;;  %1671 = vrot.lane.b32.xlu0 %v2261_v42, %s2141_s28 }
0x1523   :  { %v1662_v61 = vpop.permute.xlu1 %1661  ;;  %v1664_v46 = vpop.permute.xlu0 %1663 }
0x1524   :  { %v1683_v31 = vsel %vm21_vm1, %v2365_v62, %v1662_v61  ;;  %v1684_v35 = vsel %vm21_vm1, %v2415_v47, %v1664_v46 }
0x1525   :  { %1692 = vst.msk [vmem:[%s2635_s2 + $0x4] sm:$0x3] %vm1689_vm2, %v1683_v31  ;;  %1693 = vst.msk [vmem:[%s2635_s2 + $0x6] sm:$0x3] %vm1689_vm2, %v1684_v35 }
0x1526   :  { %1669 = vrot.lane.b32.xlu1 %v2311_v23, %s2141_s28 }
0x1527   :  { %v1666_v42 = vpop.permute.xlu1 %1665  ;;  %v1668_v24 = vpop.permute.xlu0 %1667 }
0x1528   :  { %v1685_v62 = vsel %vm21_vm1, %v2465_v32, %v1666_v42  ;;  %v1686_v47 = vsel %vm21_vm1, %v2515_v19, %v1668_v24 }
0x1529   :  { %1694 = vst.msk [vmem:[%s2635_s2 + $0x8] sm:$0x3] %vm1689_vm2, %v1685_v62  ;;  %1695 = vst.msk [vmem:[%s2635_s2 + $0xa] sm:$0x3] %vm1689_vm2, %v1686_v47 }
0x1590   :  { %v1647_v36 = vpop.permute.xlu0 %1646 }
0x1594   :  { %v1658_v23 = vpop.permute.xlu1 %1657  ;;  %v1672_v37 = vpop.permute.xlu0 %1671 }
0x1595   :  { %v1681_v38 = vsel %vm21_vm1, %v2265_v43, %v1658_v23  ;;  %v1688_v32 = vsel %vm21_vm1, %v1647_v36, %v1672_v37 }
0x1596   :  { %1690 = vst.msk [vmem:[%s2635_s2] sm:$0x3] %vm1689_vm2, %v1681_v38  ;;  %1697 = vst.msk [vmem:[%s2635_s2 + $0xe] sm:$0x3] %vm1689_vm2, %v1688_v32 }
0x1598   :  { %v1670_v19 = vpop.permute.xlu1 %1669 }
0x1599   :  { %v1687_v39 = vsel %vm21_vm1, %v2554_v54, %v1670_v19 }
0x159a   :  { %1696 = vst.msk [vmem:[%s2635_s2 + $0xc] sm:$0x3] %vm1689_vm2, %v1687_v39 }

</bundles_post_ra>
